<compile_context>
chip_gen: v6e
topology: v6e:2x2x1
jax: 0.10.0
libtpu: 0.0.40
codegen_flags: <defaults>
</compile_context>

<pallas_src>
import numpy as np
import jax
import jax.numpy as jnp
from jax import lax
from jax.experimental import pallas as pl
from jax.experimental.pallas import tpu as pltpu


# ---------------------------------------------------------------------------
# helpers
# ---------------------------------------------------------------------------
def _choose_row_tile(n_rows, t_len, in_cols, out_cols,
                     vmem_budget_bytes=8 * 1024 * 1024):
    """How many (node, batch) rows each grid step of kernel A processes.

    Budgeted against double-buffered input+output blocks so tiles always fit
    inside the scoped VMEM limit (32 MiB default; 64 MiB physical on v7x).
    Flat 2-D blocks are (tm * t_len, cols); the leading dim must be a multiple
    of 8 unless the block covers the whole array.
    """
    bytes_per_row = 4 * t_len * (in_cols + out_cols) * 2   # f32, double buffered
    cap = max(1, vmem_budget_bytes // max(1, bytes_per_row))
    cap = min(n_rows, cap, 1024)
    for tm in range(cap, 0, -1):
        if tm == n_rows or (tm * t_len) % 8 == 0:
            return tm
    return n_rows


def _fold_timeblock_params(w1, b1, w2, b2, w3, b3):
    # relu(conv1(x) + sigmoid(conv2(x)) + conv3(x))
    #   == relu(conv_{W1+W3, b1+b3}(x) + sigmoid(conv2(x)))
    return w1 + w3, (b1 + b3).reshape(1, -1), w2, b2.reshape(1, -1)


# ---------------------------------------------------------------------------
# Kernel A: TimeBlock1 fused with the Theta1 channel projection.
#   x block: (tm*T, Cin) node-major flat rows (time fastest).
#   out block: (tm*T, Cs); rows whose temporal window crosses a (node, batch)
#   boundary (t >= T-K+1) are zero padding.
# ---------------------------------------------------------------------------
def _tb1_theta_kernel(x_ref, w13_ref, b13_ref, w2_ref, b2_ref, th_ref, o_ref):
    L = x_ref.shape[0]
    K = w13_ref.shape[0]
    Lv = L - (K - 1)
    cout = w13_ref.shape[2]

    c13 = jnp.zeros((Lv, cout), jnp.float32) + b13_ref[...]
    c2 = jnp.zeros((Lv, cout), jnp.float32) + b2_ref[...]
    for k in range(K):                      # temporal taps = shifted row windows
        xk = x_ref[k:k + Lv, :]
        c13 = c13 + jnp.dot(xk, w13_ref[k], preferred_element_type=jnp.float32)
        c2 = c2 + jnp.dot(xk, w2_ref[k], preferred_element_type=jnp.float32)
    t = jnp.maximum(c13 + jax.nn.sigmoid(c2), 0.0)                    # TimeBlock1
    u = jnp.dot(t, th_ref[...], preferred_element_type=jnp.float32)   # @ Theta1
    o_ref[0:Lv, :] = u.astype(o_ref.dtype)
    o_ref[Lv:L, :] = jnp.zeros((K - 1, o_ref.shape[1]), o_ref.dtype)  # padded tail


def _timeblock1_theta(x_flat, w13, b13, w2, b2, theta, *, t_len, tm):
    rows_total, cin = x_flat.shape
    cout, cs = theta.shape
    K = w13.shape[0]
    n_groups = rows_total // t_len
    L = tm * t_len
    grid = (pl.cdiv(n_groups, tm),)
    flops = int(rows_total * (2 * K * cin * 2 * cout + 2 * cout * cs))
    bytes_accessed = int(4 * (x_flat.size + rows_total * cs
                              + w13.size + w2.size + theta.size))
    return pl.pallas_call(
        _tb1_theta_kernel,
        out_shape=jax.ShapeDtypeStruct((rows_total, cs), jnp.float32),
        grid=grid,
        in_specs=[
            pl.BlockSpec((L, cin), lambda i: (i, 0)),
            pl.BlockSpec(w13.shape, lambda i: (0, 0, 0)),
            pl.BlockSpec(b13.shape, lambda i: (0, 0)),
            pl.BlockSpec(w2.shape, lambda i: (0, 0, 0)),
            pl.BlockSpec(b2.shape, lambda i: (0, 0)),
            pl.BlockSpec(theta.shape, lambda i: (0, 0)),
        ],
        out_specs=pl.BlockSpec((L, cs), lambda i: (i, 0)),
        compiler_params=pltpu.CompilerParams(dimension_semantics=("parallel",)),
        cost_estimate=pl.CostEstimate(flops=flops,
                                      transcendentals=int(rows_total * cout),
                                      bytes_accessed=bytes_accessed),
    )(x_flat, w13, b13, w2, b2, theta)


# ---------------------------------------------------------------------------
# Kernel B: graph mixing as one wide matmul, t2 = relu(A_hat @ U)
#   U is (N, B*T*Cs), so the lane dim is large and batched across B.
# ---------------------------------------------------------------------------
def _graph_mix_kernel(a_ref, u_ref, o_ref):
    o_ref[...] = jnp.maximum(
        jnp.dot(a_ref[...], u_ref[...], preferred_element_type=jnp.float32), 0.0
    ).astype(o_ref.dtype)


def _graph_mix_relu(a_hat, u):
    n, cols = u.shape
    return pl.pallas_call(
        _graph_mix_kernel,
        out_shape=jax.ShapeDtypeStruct((n, cols), jnp.float32),
        grid=(1,),
        in_specs=[pl.BlockSpec((n, n), lambda i: (0, 0)),
                  pl.BlockSpec((n, cols), lambda i: (0, 0))],
        out_specs=pl.BlockSpec((n, cols), lambda i: (0, 0)),
        compiler_params=pltpu.CompilerParams(dimension_semantics=("arbitrary",)),
        cost_estimate=pl.CostEstimate(flops=int(2 * n * n * cols),
                                      transcendentals=0,
                                      bytes_accessed=int(4 * (n * n + 2 * n * cols))),
    )(a_hat, u)


# ---------------------------------------------------------------------------
# Kernel C: TimeBlock2 fused with BatchNorm2d(num_nodes), one node per step.
#   Input block (1, B, T, Cs) node-major; output block (B, 1, T2, Cout) written
#   directly into the (B, N, T2, Cout) result (no transposes).
# ---------------------------------------------------------------------------
def _tb2_bn_kernel(x_ref, w13_ref, b13_ref, w2_ref, b2_ref, g_ref, beta_ref,
                   o_ref, t3_ref):
    n = pl.program_id(0)
    K = w13_ref.shape[0]
    bsz = o_ref.shape[0]
    t2_len = o_ref.shape[2]
    cout = o_ref.shape[3]

    for b in range(bsz):                                 # static, small batch
        c13 = jnp.zeros((t2_len, cout), jnp.float32) + b13_ref[...]
        c2 = jnp.zeros((t2_len, cout), jnp.float32) + b2_ref[...]
        for k in range(K):
            xk = x_ref[0, b, k:k + t2_len, :]            # (T2, Cs) temporal tap
            c13 = c13 + jnp.dot(xk, w13_ref[k], preferred_element_type=jnp.float32)
            c2 = c2 + jnp.dot(xk, w2_ref[k], preferred_element_type=jnp.float32)
        t3_ref[b] = jnp.maximum(c13 + jax.nn.sigmoid(c2), 0.0)

    # BatchNorm2d(num_nodes), training mode: biased batch stats per node, eps=1e-5.
    t3 = t3_ref[...]
    mean = jnp.mean(t3)
    var = jnp.mean((t3 - mean) ** 2)
    inv = lax.rsqrt(var + 1e-5)
    gain = g_ref[n]
    shift = beta_ref[n]
    for b in range(bsz):
        o_ref[b, 0] = ((t3_ref[b] - mean) * inv * gain + shift).astype(o_ref.dtype)


def _timeblock2_batchnorm(t2r, w13, b13, w2, b2, gamma, beta, *, t2_len):
    n, bsz, t_in, cs = t2r.shape
    cout = w13.shape[2]
    K = w13.shape[0]
    return pl.pallas_call(
        _tb2_bn_kernel,
        out_shape=jax.ShapeDtypeStruct((bsz, n, t2_len, cout), jnp.float32),
        grid=(n,),
        in_specs=[
            pl.BlockSpec((1, bsz, t_in, cs), lambda i: (i, 0, 0, 0)),
            pl.BlockSpec(w13.shape, lambda i: (0, 0, 0)),
            pl.BlockSpec(b13.shape, lambda i: (0, 0)),
            pl.BlockSpec(w2.shape, lambda i: (0, 0, 0)),
            pl.BlockSpec(b2.shape, lambda i: (0, 0)),
            pl.BlockSpec(memory_space=pltpu.MemorySpace.SMEM),
            pl.BlockSpec(memory_space=pltpu.MemorySpace.SMEM),
        ],
        out_specs=pl.BlockSpec((bsz, 1, t2_len, cout), lambda i: (0, i, 0, 0)),
        scratch_shapes=[pltpu.VMEM((bsz, t2_len, cout), jnp.float32)],
        compiler_params=pltpu.CompilerParams(dimension_semantics=("parallel",)),
        cost_estimate=pl.CostEstimate(
            flops=int(n * bsz * t2_len * 2 * K * cs * 2 * cout),
            transcendentals=int(n * bsz * t2_len * cout),
            bytes_accessed=int(4 * (t2r.size + bsz * n * t2_len * cout))),
    )(t2r, w13, b13, w2, b2, gamma, beta)


# ---------------------------------------------------------------------------
# Full STGCNBlock forward
# ---------------------------------------------------------------------------
def stgcn_block_forward(X, A_hat, p, *, vmem_budget_bytes=8 * 1024 * 1024):
    B, N, T, Cin = X.shape
    K = p["t1_w1"].shape[0]
    Cs = p["theta1"].shape[1]
    T1 = T - K + 1
    T2 = T1 - K + 1

    w13a, b13a, w2a, b2a = _fold_timeblock_params(
        p["t1_w1"], p["t1_b1"], p["t1_w2"], p["t1_b2"], p["t1_w3"], p["t1_b3"])
    w13b, b13b, w2b, b2b = _fold_timeblock_params(
        p["t2_w1"], p["t2_b1"], p["t2_w2"], p["t2_b2"], p["t2_w3"], p["t2_b3"])

    # Node-major flat layout (N*B*T, Cin): the graph matmul then needs no
    # transposes and kernel C writes the (B, N, T2, Cout) output directly.
    x_flat = jnp.transpose(X, (1, 0, 2, 3)).reshape(N * B * T, Cin)

    tm = _choose_row_tile(N * B, T, Cin, Cs, vmem_budget_bytes)
    # u = (TimeBlock1 output) @ Theta1, flat (N*B*T, Cs); t >= T1 rows are padding.
    u_flat = _timeblock1_theta(x_flat, w13a, b13a, w2a, b2a, p["theta1"],
                               t_len=T, tm=tm)

    # relu(A_hat @ (t @ Theta1)) == relu((A_hat @ t) @ Theta1): one wide matmul.
    t2_full = _graph_mix_relu(A_hat, u_flat.reshape(N, B * T * Cs))
    t2r = t2_full.reshape(N, B, T, Cs)

    # TODO(synk): BatchNorm2d is implemented in training mode (batch statistics);
    # running-mean/var tracking and eval mode are not implemented.
    return _timeblock2_batchnorm(t2r, w13b, b13b, w2b, b2b,
                                 p["bn_gamma"], p["bn_beta"], t2_len=T2)


# ---------------------------------------------------------------------------
# Pure-JAX reference (for correctness check)
# ---------------------------------------------------------------------------
def _timeblock_ref(x, w1, b1, w2, b2, w3, b3):
    K = w1.shape[0]
    T_out = x.shape[2] - K + 1

    def conv(w, b):
        acc = 0.0
        for k in range(K):
            acc = acc + jnp.einsum('bntc,cd->bntd', x[:, :, k:k + T_out, :], w[k])
        return acc + b

    return jax.nn.relu(conv(w1, b1) + jax.nn.sigmoid(conv(w2, b2)) + conv(w3, b3))


def stgcn_ref(X, A_hat, p):
    t = _timeblock_ref(X, p["t1_w1"], p["t1_b1"], p["t1_w2"], p["t1_b2"], p["t1_w3"], p["t1_b3"])
    lfs = jnp.einsum('ij,bjtc->bitc', A_hat, t)
    t2 = jax.nn.relu(jnp.einsum('bitc,cd->bitd', lfs, p["theta1"]))
    t3 = _timeblock_ref(t2, p["t2_w1"], p["t2_b1"], p["t2_w2"], p["t2_b2"], p["t2_w3"], p["t2_b3"])
    mean = jnp.mean(t3, axis=(0, 2, 3), keepdims=True)
    var = jnp.mean((t3 - mean) ** 2, axis=(0, 2, 3), keepdims=True)
    g = p["bn_gamma"].reshape(1, -1, 1, 1)
    b = p["bn_beta"].reshape(1, -1, 1, 1)
    return (t3 - mean) * lax.rsqrt(var + 1e-5) * g + b


if __name__ == "__main__":
    # Small shapes consistent with the module's forward.
    B, N, T = 2, 8, 12
    Cin, Cs, Cout, K = 4, 16, 32, 3

    key = jax.random.PRNGKey(0)
    ks = jax.random.split(key, 16)
    u = lambda k, shape, bound: jax.random.uniform(k, shape, jnp.float32, -bound, bound)
    bnd1 = 1.0 / np.sqrt(Cin * K)   # PyTorch Conv2d default bound ~ 1/sqrt(fan_in)
    bnd2 = 1.0 / np.sqrt(Cs * K)

    params = {
        "t1_w1": u(ks[0], (K, Cin, Cout), bnd1), "t1_b1": u(ks[1], (Cout,), bnd1),
        "t1_w2": u(ks[2], (K, Cin, Cout), bnd1), "t1_b2": u(ks[3], (Cout,), bnd1),
        "t1_w3": u(ks[4], (K, Cin, Cout), bnd1), "t1_b3": u(ks[5], (Cout,), bnd1),
        "theta1": u(ks[6], (Cout, Cs), 1.0 / np.sqrt(Cs)),
        "t2_w1": u(ks[7], (K, Cs, Cout), bnd2), "t2_b1": u(ks[8], (Cout,), bnd2),
        "t2_w2": u(ks[9], (K, Cs, Cout), bnd2), "t2_b2": u(ks[10], (Cout,), bnd2),
        "t2_w3": u(ks[11], (K, Cs, Cout), bnd2), "t2_b3": u(ks[12], (Cout,), bnd2),
        "bn_gamma": jnp.ones((N,), jnp.float32),   # BatchNorm2d default affine init
        "bn_beta": jnp.zeros((N,), jnp.float32),
    }

    X = jax.random.normal(ks[13], (B, N, T, Cin), jnp.float32)
    A = jax.random.uniform(ks[14], (N, N), jnp.float32, 0.0, 1.0)
    A_hat = A / jnp.sum(A, axis=1, keepdims=True)  # synthetic normalized adjacency

    fwd = jax.jit(stgcn_block_forward)
    out = jax.block_until_ready(fwd(X, A_hat, params))
    ref = jax.block_until_ready(stgcn_ref(X, A_hat, params))

    assert out.shape == (B, N, T - 2 * (K - 1), Cout), out.shape
    np.testing.assert_allclose(np.asarray(out), np.asarray(ref), rtol=1e-3, atol=1e-3)
    print("KERNEL_OK")
</pallas_src>

<mosaic_0001>
module attributes {stable_mosaic.version = 11 : i64} {
  func.func @_graph_mix_kernel(%arg0: i32, %arg1: memref<8x8xf32, #tpu.memory_space<vmem>>, %arg2: memref<8x384xf32, #tpu.memory_space<vmem>>, %arg3: memref<8x384xf32, #tpu.memory_space<vmem>>) attributes {dimension_semantics = [#tpu.dimension_semantics<arbitrary>], iteration_bounds = array<i64: 1>, scalar_prefetch = 0 : i64, scratch_operands = 0 : i64, tpu.core_type = #tpu.core_type<tc>, window_params = [{pipeline_mode = #tpu.pipeline_mode<synchronous>, transform_indices = @transform_0, window_bounds = array<i64: 8, 8>}, {pipeline_mode = #tpu.pipeline_mode<synchronous>, transform_indices = @transform_1, window_bounds = array<i64: 8, 384>}, {pipeline_mode = #tpu.pipeline_mode<synchronous>, transform_indices = @transform_2, window_bounds = array<i64: 8, 384>}]} {
    %c0 = arith.constant 0 : index
    %c0_0 = arith.constant 0 : index
    %0 = vector.load %arg1[%c0, %c0_0] : memref<8x8xf32, #tpu.memory_space<vmem>>, vector<8x8xf32>
    %c0_1 = arith.constant 0 : index
    %c0_2 = arith.constant 0 : index
    %1 = vector.load %arg2[%c0_1, %c0_2] : memref<8x384xf32, #tpu.memory_space<vmem>>, vector<8x384xf32>
    %cst = arith.constant dense<0.000000e+00> : vector<8x384xf32>
    %2 = tpu.matmul %0, %1, %cst {dimension_numbers = #tpu.dot_dimension_numbers<[1], [0], [0], [1], [0, 0, 1, 1], [], []>} : vector<8x8xf32>, vector<8x384xf32>, vector<8x384xf32> -> vector<8x384xf32>
    %cst_3 = arith.constant 0.000000e+00 : f32
    %3 = vector.broadcast %cst_3 : f32 to vector<8x384xf32>
    %4 = arith.maximumf %2, %3 : vector<8x384xf32>
    %c0_4 = arith.constant 0 : index
    %c0_5 = arith.constant 0 : index
    %5 = vector.load %arg3[%c0_4, %c0_5] : memref<8x384xf32, #tpu.memory_space<vmem>>, vector<8x384xf32>
    tpu.vector_store %arg3[%c0_4, %c0_5], %4 {strides = array<i32>} : memref<8x384xf32, #tpu.memory_space<vmem>>, vector<8x384xf32>,
    return
  }
  func.func @transform_0(%arg0: i32) -> (i32, i32) {
    %c0_i32 = arith.constant 0 : i32
    %c0_i32_0 = arith.constant 0 : i32
    %c0_i32_1 = arith.constant 0 : i32
    return %c0_i32, %c0_i32_0 : i32, i32
  }
  func.func @transform_1(%arg0: i32) -> (i32, i32) {
    %c0_i32 = arith.constant 0 : i32
    %c0_i32_0 = arith.constant 0 : i32
    %c0_i32_1 = arith.constant 0 : i32
    return %c0_i32, %c0_i32_0 : i32, i32
  }
  func.func @transform_2(%arg0: i32) -> (i32, i32) {
    %c0_i32 = arith.constant 0 : i32
    %c0_i32_0 = arith.constant 0 : i32
    %c0_i32_1 = arith.constant 0 : i32
    return %c0_i32, %c0_i32_0 : i32, i32
  }
}

module attributes {stable_mosaic.version = 11 : i64} {
  func.func @_tb1_theta_kernel(%arg0: i32, %arg1: memref<192x4xf32, #tpu.memory_space<vmem>>, %arg2: memref<3x4x32xf32, #tpu.memory_space<vmem>>, %arg3: memref<1x32xf32, #tpu.memory_space<vmem>>, %arg4: memref<3x4x32xf32, #tpu.memory_space<vmem>>, %arg5: memref<1x32xf32, #tpu.memory_space<vmem>>, %arg6: memref<32x16xf32, #tpu.memory_space<vmem>>, %arg7: memref<192x16xf32, #tpu.memory_space<vmem>>) attributes {dimension_semantics = [#tpu.dimension_semantics<parallel>], iteration_bounds = array<i64: 1>, scalar_prefetch = 0 : i64, scratch_operands = 0 : i64, tpu.core_type = #tpu.core_type<tc>, window_params = [{transform_indices = @transform_0, window_bounds = array<i64: 192, 4>}, {pipeline_mode = #tpu.pipeline_mode<synchronous>, transform_indices = @transform_1, window_bounds = array<i64: 3, 4, 32>}, {pipeline_mode = #tpu.pipeline_mode<synchronous>, transform_indices = @transform_2, window_bounds = array<i64: 1, 32>}, {pipeline_mode = #tpu.pipeline_mode<synchronous>, transform_indices = @transform_3, window_bounds = array<i64: 3, 4, 32>}, {pipeline_mode = #tpu.pipeline_mode<synchronous>, transform_indices = @transform_4, window_bounds = array<i64: 1, 32>}, {pipeline_mode = #tpu.pipeline_mode<synchronous>, transform_indices = @transform_5, window_bounds = array<i64: 32, 16>}, {transform_indices = @transform_6, window_bounds = array<i64: 192, 16>}]} {
    %cst = arith.constant 0.000000e+00 : f32
    %0 = vector.broadcast %cst : f32 to vector<190x32xf32>
    %c0 = arith.constant 0 : index
    %c0_0 = arith.constant 0 : index
    %1 = vector.load %arg3[%c0, %c0_0] : memref<1x32xf32, #tpu.memory_space<vmem>>, vector<1x32xf32>
    %2 = vector.broadcast %1 : vector<1x32xf32> to vector<190x32xf32>
    %3 = arith.addf %0, %2 : vector<190x32xf32>
    %cst_1 = arith.constant 0.000000e+00 : f32
    %4 = vector.broadcast %cst_1 : f32 to vector<190x32xf32>
    %c0_2 = arith.constant 0 : index
    %c0_3 = arith.constant 0 : index
    %5 = vector.load %arg5[%c0_2, %c0_3] : memref<1x32xf32, #tpu.memory_space<vmem>>, vector<1x32xf32>
    %6 = vector.broadcast %5 : vector<1x32xf32> to vector<190x32xf32>
    %7 = arith.addf %4, %6 : vector<190x32xf32>
    %c0_4 = arith.constant 0 : index
    %c0_5 = arith.constant 0 : index
    %8 = vector.load %arg1[%c0_4, %c0_5] : memref<192x4xf32, #tpu.memory_space<vmem>>, vector<190x4xf32>
    %c0_6 = arith.constant 0 : index
    %c0_7 = arith.constant 0 : index
    %c0_8 = arith.constant 0 : index
    %9 = vector.load %arg2[%c0_6, %c0_7, %c0_8] : memref<3x4x32xf32, #tpu.memory_space<vmem>>, vector<1x4x32xf32>
    %10 = vector.shape_cast %9 : vector<1x4x32xf32> to vector<4x32xf32>
    %cst_9 = arith.constant dense<0.000000e+00> : vector<190x32xf32>
    %11 = tpu.matmul %8, %10, %cst_9 {dimension_numbers = #tpu.dot_dimension_numbers<[1], [0], [0], [1], [0, 0, 1, 1], [], []>} : vector<190x4xf32>, vector<4x32xf32>, vector<190x32xf32> -> vector<190x32xf32>
    %12 = arith.addf %3, %11 : vector<190x32xf32>
    %c0_10 = arith.constant 0 : index
    %c0_11 = arith.constant 0 : index
    %c0_12 = arith.constant 0 : index
    %13 = vector.load %arg4[%c0_10, %c0_11, %c0_12] : memref<3x4x32xf32, #tpu.memory_space<vmem>>, vector<1x4x32xf32>
    %14 = vector.shape_cast %13 : vector<1x4x32xf32> to vector<4x32xf32>
    %cst_13 = arith.constant dense<0.000000e+00> : vector<190x32xf32>
    %15 = tpu.matmul %8, %14, %cst_13 {dimension_numbers = #tpu.dot_dimension_numbers<[1], [0], [0], [1], [0, 0, 1, 1], [], []>} : vector<190x4xf32>, vector<4x32xf32>, vector<190x32xf32> -> vector<190x32xf32>
    %16 = arith.addf %7, %15 : vector<190x32xf32>
    %c1 = arith.constant 1 : index
    %c0_14 = arith.constant 0 : index
    %17 = vector.load %arg1[%c1, %c0_14] : memref<192x4xf32, #tpu.memory_space<vmem>>, vector<190x4xf32>
    %c1_15 = arith.constant 1 : index
    %c0_16 = arith.constant 0 : index
    %c0_17 = arith.constant 0 : index
    %18 = vector.load %arg2[%c1_15, %c0_16, %c0_17] : memref<3x4x32xf32, #tpu.memory_space<vmem>>, vector<1x4x32xf32>
    %19 = vector.shape_cast %18 : vector<1x4x32xf32> to vector<4x32xf32>
    %cst_18 = arith.constant dense<0.000000e+00> : vector<190x32xf32>
    %20 = tpu.matmul %17, %19, %cst_18 {dimension_numbers = #tpu.dot_dimension_numbers<[1], [0], [0], [1], [0, 0, 1, 1], [], []>} : vector<190x4xf32>, vector<4x32xf32>, vector<190x32xf32> -> vector<190x32xf32>
    %21 = arith.addf %12, %20 : vector<190x32xf32>
    %c1_19 = arith.constant 1 : index
    %c0_20 = arith.constant 0 : index
    %c0_21 = arith.constant 0 : index
    %22 = vector.load %arg4[%c1_19, %c0_20, %c0_21] : memref<3x4x32xf32, #tpu.memory_space<vmem>>, vector<1x4x32xf32>
    %23 = vector.shape_cast %22 : vector<1x4x32xf32> to vector<4x32xf32>
    %cst_22 = arith.constant dense<0.000000e+00> : vector<190x32xf32>
    %24 = tpu.matmul %17, %23, %cst_22 {dimension_numbers = #tpu.dot_dimension_numbers<[1], [0], [0], [1], [0, 0, 1, 1], [], []>} : vector<190x4xf32>, vector<4x32xf32>, vector<190x32xf32> -> vector<190x32xf32>
    %25 = arith.addf %16, %24 : vector<190x32xf32>
    %c2 = arith.constant 2 : index
    %c0_23 = arith.constant 0 : index
    %26 = vector.load %arg1[%c2, %c0_23] : memref<192x4xf32, #tpu.memory_space<vmem>>, vector<190x4xf32>
    %c2_24 = arith.constant 2 : index
    %c0_25 = arith.constant 0 : index
    %c0_26 = arith.constant 0 : index
    %27 = vector.load %arg2[%c2_24, %c0_25, %c0_26] : memref<3x4x32xf32, #tpu.memory_space<vmem>>, vector<1x4x32xf32>
    %28 = vector.shape_cast %27 : vector<1x4x32xf32> to vector<4x32xf32>
    %cst_27 = arith.constant dense<0.000000e+00> : vector<190x32xf32>
    %29 = tpu.matmul %26, %28, %cst_27 {dimension_numbers = #tpu.dot_dimension_numbers<[1], [0], [0], [1], [0, 0, 1, 1], [], []>} : vector<190x4xf32>, vector<4x32xf32>, vector<190x32xf32> -> vector<190x32xf32>
    %30 = arith.addf %21, %29 : vector<190x32xf32>
    %c2_28 = arith.constant 2 : index
    %c0_29 = arith.constant 0 : index
    %c0_30 = arith.constant 0 : index
    %31 = vector.load %arg4[%c2_28, %c0_29, %c0_30] : memref<3x4x32xf32, #tpu.memory_space<vmem>>, vector<1x4x32xf32>
    %32 = vector.shape_cast %31 : vector<1x4x32xf32> to vector<4x32xf32>
    %cst_31 = arith.constant dense<0.000000e+00> : vector<190x32xf32>
    %33 = tpu.matmul %26, %32, %cst_31 {dimension_numbers = #tpu.dot_dimension_numbers<[1], [0], [0], [1], [0, 0, 1, 1], [], []>} : vector<190x4xf32>, vector<4x32xf32>, vector<190x32xf32> -> vector<190x32xf32>
    %34 = arith.addf %25, %33 : vector<190x32xf32>
    %35 = arith.negf %34 : vector<190x32xf32>
    %36 = math.exp %35 : vector<190x32xf32>
    %cst_32 = arith.constant 1.000000e+00 : f32
    %37 = vector.broadcast %cst_32 : f32 to vector<190x32xf32>
    %38 = arith.addf %37, %36 : vector<190x32xf32>
    %39 = arith.divf %37, %38 : vector<190x32xf32>
    %40 = arith.addf %30, %39 : vector<190x32xf32>
    %cst_33 = arith.constant 0.000000e+00 : f32
    %41 = vector.broadcast %cst_33 : f32 to vector<190x32xf32>
    %42 = arith.maximumf %40, %41 : vector<190x32xf32>
    %c0_34 = arith.constant 0 : index
    %c0_35 = arith.constant 0 : index
    %43 = vector.load %arg6[%c0_34, %c0_35] : memref<32x16xf32, #tpu.memory_space<vmem>>, vector<32x16xf32>
    %cst_36 = arith.constant dense<0.000000e+00> : vector<190x16xf32>
    %44 = tpu.matmul %42, %43, %cst_36 {dimension_numbers = #tpu.dot_dimension_numbers<[1], [0], [0], [1], [0, 0, 1, 1], [], []>} : vector<190x32xf32>, vector<32x16xf32>, vector<190x16xf32> -> vector<190x16xf32>
    %c0_37 = arith.constant 0 : index
    %c0_38 = arith.constant 0 : index
    %45 = vector.load %arg7[%c0_37, %c0_38] : memref<192x16xf32, #tpu.memory_space<vmem>>, vector<190x16xf32>
    tpu.vector_store %arg7[%c0_37, %c0_38], %44 {strides = array<i32>} : memref<192x16xf32, #tpu.memory_space<vmem>>, vector<190x16xf32>,
    %cst_39 = arith.constant 0.000000e+00 : f32
    %46 = vector.broadcast %cst_39 : f32 to vector<2x16xf32>
    %c190 = arith.constant 190 : index
    %c0_40 = arith.constant 0 : index
    %47 = vector.load %arg7[%c190, %c0_40] : memref<192x16xf32, #tpu.memory_space<vmem>>, vector<2x16xf32>
    tpu.vector_store %arg7[%c190, %c0_40], %46 {strides = array<i32>} : memref<192x16xf32, #tpu.memory_space<vmem>>, vector<2x16xf32>,
    return
  }
  func.func @transform_0(%arg0: i32) -> (i32, i32) {
    %c0_i32 = arith.constant 0 : i32
    %c0_i32_0 = arith.constant 0 : i32
    return %arg0, %c0_i32 : i32, i32
  }
  func.func @transform_1(%arg0: i32) -> (i32, i32, i32) {
    %c0_i32 = arith.constant 0 : i32
    %c0_i32_0 = arith.constant 0 : i32
    %c0_i32_1 = arith.constant 0 : i32
    %c0_i32_2 = arith.constant 0 : i32
    return %c0_i32, %c0_i32_0, %c0_i32_1 : i32, i32, i32
  }
  func.func @transform_2(%arg0: i32) -> (i32, i32) {
    %c0_i32 = arith.constant 0 : i32
    %c0_i32_0 = arith.constant 0 : i32
    %c0_i32_1 = arith.constant 0 : i32
    return %c0_i32, %c0_i32_0 : i32, i32
  }
  func.func @transform_3(%arg0: i32) -> (i32, i32, i32) {
    %c0_i32 = arith.constant 0 : i32
    %c0_i32_0 = arith.constant 0 : i32
    %c0_i32_1 = arith.constant 0 : i32
    %c0_i32_2 = arith.constant 0 : i32
    return %c0_i32, %c0_i32_0, %c0_i32_1 : i32, i32, i32
  }
  func.func @transform_4(%arg0: i32) -> (i32, i32) {
    %c0_i32 = arith.constant 0 : i32
    %c0_i32_0 = arith.constant 0 : i32
    %c0_i32_1 = arith.constant 0 : i32
    return %c0_i32, %c0_i32_0 : i32, i32
  }
  func.func @transform_5(%arg0: i32) -> (i32, i32) {
    %c0_i32 = arith.constant 0 : i32
    %c0_i32_0 = arith.constant 0 : i32
    %c0_i32_1 = arith.constant 0 : i32
    return %c0_i32, %c0_i32_0 : i32, i32
  }
  func.func @transform_6(%arg0: i32) -> (i32, i32) {
    %c0_i32 = arith.constant 0 : i32
    %c0_i32_0 = arith.constant 0 : i32
    return %arg0, %c0_i32 : i32, i32
  }
}

module attributes {stable_mosaic.version = 11 : i64} {
  func.func @_tb2_bn_kernel(%arg0: i32, %arg1: memref<1x2x12x16xf32, #tpu.memory_space<vmem>>, %arg2: memref<3x16x32xf32, #tpu.memory_space<vmem>>, %arg3: memref<1x32xf32, #tpu.memory_space<vmem>>, %arg4: memref<3x16x32xf32, #tpu.memory_space<vmem>>, %arg5: memref<1x32xf32, #tpu.memory_space<vmem>>, %arg6: memref<8xf32, #tpu.memory_space<smem>>, %arg7: memref<8xf32, #tpu.memory_space<smem>>, %arg8: memref<2x1x8x32xf32, #tpu.memory_space<vmem>>, %arg9: memref<2x8x32xf32, #tpu.memory_space<vmem>>) attributes {dimension_semantics = [#tpu.dimension_semantics<parallel>], iteration_bounds = array<i64: 8>, scalar_prefetch = 0 : i64, scratch_operands = 1 : i64, tpu.core_type = #tpu.core_type<tc>, window_params = [{transform_indices = @transform_0, window_bounds = array<i64: 1, 2, 12, 16>}, {pipeline_mode = #tpu.pipeline_mode<synchronous>, transform_indices = @transform_1, window_bounds = array<i64: 3, 16, 32>}, {pipeline_mode = #tpu.pipeline_mode<synchronous>, transform_indices = @transform_2, window_bounds = array<i64: 1, 32>}, {pipeline_mode = #tpu.pipeline_mode<synchronous>, transform_indices = @transform_3, window_bounds = array<i64: 3, 16, 32>}, {pipeline_mode = #tpu.pipeline_mode<synchronous>, transform_indices = @transform_4, window_bounds = array<i64: 1, 32>}, {transform_indices = @transform_5, window_bounds = array<i64: 8>}, {transform_indices = @transform_6, window_bounds = array<i64: 8>}, {transform_indices = @transform_7, window_bounds = array<i64: 2, 1, 8, 32>}]} {
    %cst = arith.constant 0.000000e+00 : f32
    %0 = vector.broadcast %cst : f32 to vector<8x32xf32>
    %c0 = arith.constant 0 : index
    %c0_0 = arith.constant 0 : index
    %1 = vector.load %arg3[%c0, %c0_0] : memref<1x32xf32, #tpu.memory_space<vmem>>, vector<1x32xf32>
    %2 = vector.broadcast %1 : vector<1x32xf32> to vector<8x32xf32>
    %3 = arith.addf %0, %2 : vector<8x32xf32>
    %cst_1 = arith.constant 0.000000e+00 : f32
    %4 = vector.broadcast %cst_1 : f32 to vector<8x32xf32>
    %c0_2 = arith.constant 0 : index
    %c0_3 = arith.constant 0 : index
    %5 = vector.load %arg5[%c0_2, %c0_3] : memref<1x32xf32, #tpu.memory_space<vmem>>, vector<1x32xf32>
    %6 = vector.broadcast %5 : vector<1x32xf32> to vector<8x32xf32>
    %7 = arith.addf %4, %6 : vector<8x32xf32>
    %c0_4 = arith.constant 0 : index
    %c0_5 = arith.constant 0 : index
    %c0_6 = arith.constant 0 : index
    %c0_7 = arith.constant 0 : index
    %8 = vector.load %arg1[%c0_4, %c0_5, %c0_6, %c0_7] : memref<1x2x12x16xf32, #tpu.memory_space<vmem>>, vector<1x1x8x16xf32>
    %9 = vector.shape_cast %8 : vector<1x1x8x16xf32> to vector<8x16xf32>
    %c0_8 = arith.constant 0 : index
    %c0_9 = arith.constant 0 : index
    %c0_10 = arith.constant 0 : index
    %10 = vector.load %arg2[%c0_8, %c0_9, %c0_10] : memref<3x16x32xf32, #tpu.memory_space<vmem>>, vector<1x16x32xf32>
    %11 = vector.shape_cast %10 : vector<1x16x32xf32> to vector<16x32xf32>
    %cst_11 = arith.constant dense<0.000000e+00> : vector<8x32xf32>
    %12 = tpu.matmul %9, %11, %cst_11 {dimension_numbers = #tpu.dot_dimension_numbers<[1], [0], [0], [1], [0, 0, 1, 1], [], []>} : vector<8x16xf32>, vector<16x32xf32>, vector<8x32xf32> -> vector<8x32xf32>
    %13 = arith.addf %3, %12 : vector<8x32xf32>
    %c0_12 = arith.constant 0 : index
    %c0_13 = arith.constant 0 : index
    %c0_14 = arith.constant 0 : index
    %14 = vector.load %arg4[%c0_12, %c0_13, %c0_14] : memref<3x16x32xf32, #tpu.memory_space<vmem>>, vector<1x16x32xf32>
    %15 = vector.shape_cast %14 : vector<1x16x32xf32> to vector<16x32xf32>
    %cst_15 = arith.constant dense<0.000000e+00> : vector<8x32xf32>
    %16 = tpu.matmul %9, %15, %cst_15 {dimension_numbers = #tpu.dot_dimension_numbers<[1], [0], [0], [1], [0, 0, 1, 1], [], []>} : vector<8x16xf32>, vector<16x32xf32>, vector<8x32xf32> -> vector<8x32xf32>
    %17 = arith.addf %7, %16 : vector<8x32xf32>
    %c0_16 = arith.constant 0 : index
    %c0_17 = arith.constant 0 : index
    %c1 = arith.constant 1 : index
    %c0_18 = arith.constant 0 : index
    %18 = vector.load %arg1[%c0_16, %c0_17, %c1, %c0_18] : memref<1x2x12x16xf32, #tpu.memory_space<vmem>>, vector<1x1x8x16xf32>
    %19 = vector.shape_cast %18 : vector<1x1x8x16xf32> to vector<8x16xf32>
    %c1_19 = arith.constant 1 : index
    %c0_20 = arith.constant 0 : index
    %c0_21 = arith.constant 0 : index
    %20 = vector.load %arg2[%c1_19, %c0_20, %c0_21] : memref<3x16x32xf32, #tpu.memory_space<vmem>>, vector<1x16x32xf32>
    %21 = vector.shape_cast %20 : vector<1x16x32xf32> to vector<16x32xf32>
    %cst_22 = arith.constant dense<0.000000e+00> : vector<8x32xf32>
    %22 = tpu.matmul %19, %21, %cst_22 {dimension_numbers = #tpu.dot_dimension_numbers<[1], [0], [0], [1], [0, 0, 1, 1], [], []>} : vector<8x16xf32>, vector<16x32xf32>, vector<8x32xf32> -> vector<8x32xf32>
    %23 = arith.addf %13, %22 : vector<8x32xf32>
    %c1_23 = arith.constant 1 : index
    %c0_24 = arith.constant 0 : index
    %c0_25 = arith.constant 0 : index
    %24 = vector.load %arg4[%c1_23, %c0_24, %c0_25] : memref<3x16x32xf32, #tpu.memory_space<vmem>>, vector<1x16x32xf32>
    %25 = vector.shape_cast %24 : vector<1x16x32xf32> to vector<16x32xf32>
    %cst_26 = arith.constant dense<0.000000e+00> : vector<8x32xf32>
    %26 = tpu.matmul %19, %25, %cst_26 {dimension_numbers = #tpu.dot_dimension_numbers<[1], [0], [0], [1], [0, 0, 1, 1], [], []>} : vector<8x16xf32>, vector<16x32xf32>, vector<8x32xf32> -> vector<8x32xf32>
    %27 = arith.addf %17, %26 : vector<8x32xf32>
    %c0_27 = arith.constant 0 : index
    %c0_28 = arith.constant 0 : index
    %c2 = arith.constant 2 : index
    %c0_29 = arith.constant 0 : index
    %28 = vector.load %arg1[%c0_27, %c0_28, %c2, %c0_29] : memref<1x2x12x16xf32, #tpu.memory_space<vmem>>, vector<1x1x8x16xf32>
    %29 = vector.shape_cast %28 : vector<1x1x8x16xf32> to vector<8x16xf32>
    %c2_30 = arith.constant 2 : index
    %c0_31 = arith.constant 0 : index
    %c0_32 = arith.constant 0 : index
    %30 = vector.load %arg2[%c2_30, %c0_31, %c0_32] : memref<3x16x32xf32, #tpu.memory_space<vmem>>, vector<1x16x32xf32>
    %31 = vector.shape_cast %30 : vector<1x16x32xf32> to vector<16x32xf32>
    %cst_33 = arith.constant dense<0.000000e+00> : vector<8x32xf32>
    %32 = tpu.matmul %29, %31, %cst_33 {dimension_numbers = #tpu.dot_dimension_numbers<[1], [0], [0], [1], [0, 0, 1, 1], [], []>} : vector<8x16xf32>, vector<16x32xf32>, vector<8x32xf32> -> vector<8x32xf32>
    %33 = arith.addf %23, %32 : vector<8x32xf32>
    %c2_34 = arith.constant 2 : index
    %c0_35 = arith.constant 0 : index
    %c0_36 = arith.constant 0 : index
    %34 = vector.load %arg4[%c2_34, %c0_35, %c0_36] : memref<3x16x32xf32, #tpu.memory_space<vmem>>, vector<1x16x32xf32>
    %35 = vector.shape_cast %34 : vector<1x16x32xf32> to vector<16x32xf32>
    %cst_37 = arith.constant dense<0.000000e+00> : vector<8x32xf32>
    %36 = tpu.matmul %29, %35, %cst_37 {dimension_numbers = #tpu.dot_dimension_numbers<[1], [0], [0], [1], [0, 0, 1, 1], [], []>} : vector<8x16xf32>, vector<16x32xf32>, vector<8x32xf32> -> vector<8x32xf32>
    %37 = arith.addf %27, %36 : vector<8x32xf32>
    %38 = arith.negf %37 : vector<8x32xf32>
    %39 = math.exp %38 : vector<8x32xf32>
    %cst_38 = arith.constant 1.000000e+00 : f32
    %40 = vector.broadcast %cst_38 : f32 to vector<8x32xf32>
    %41 = arith.addf %40, %39 : vector<8x32xf32>
    %42 = arith.divf %40, %41 : vector<8x32xf32>
    %43 = arith.addf %33, %42 : vector<8x32xf32>
    %cst_39 = arith.constant 0.000000e+00 : f32
    %44 = vector.broadcast %cst_39 : f32 to vector<8x32xf32>
    %45 = arith.maximumf %43, %44 : vector<8x32xf32>
    %c0_40 = arith.constant 0 : index
    %c0_41 = arith.constant 0 : index
    %c0_42 = arith.constant 0 : index
    %46 = vector.load %arg9[%c0_40, %c0_41, %c0_42] : memref<2x8x32xf32, #tpu.memory_space<vmem>>, vector<1x8x32xf32>
    %47 = vector.shape_cast %46 : vector<1x8x32xf32> to vector<8x32xf32>
    %48 = vector.shape_cast %45 : vector<8x32xf32> to vector<1x8x32xf32>
    tpu.vector_store %arg9[%c0_40, %c0_41, %c0_42], %48 {strides = array<i32>} : memref<2x8x32xf32, #tpu.memory_space<vmem>>, vector<1x8x32xf32>,
    %cst_43 = arith.constant 0.000000e+00 : f32
    %49 = vector.broadcast %cst_43 : f32 to vector<8x32xf32>
    %c0_44 = arith.constant 0 : index
    %c0_45 = arith.constant 0 : index
    %50 = vector.load %arg3[%c0_44, %c0_45] : memref<1x32xf32, #tpu.memory_space<vmem>>, vector<1x32xf32>
    %51 = vector.broadcast %50 : vector<1x32xf32> to vector<8x32xf32>
    %52 = arith.addf %49, %51 : vector<8x32xf32>
    %cst_46 = arith.constant 0.000000e+00 : f32
    %53 = vector.broadcast %cst_46 : f32 to vector<8x32xf32>
    %c0_47 = arith.constant 0 : index
    %c0_48 = arith.constant 0 : index
    %54 = vector.load %arg5[%c0_47, %c0_48] : memref<1x32xf32, #tpu.memory_space<vmem>>, vector<1x32xf32>
    %55 = vector.broadcast %54 : vector<1x32xf32> to vector<8x32xf32>
    %56 = arith.addf %53, %55 : vector<8x32xf32>
    %c0_49 = arith.constant 0 : index
    %c1_50 = arith.constant 1 : index
    %c0_51 = arith.constant 0 : index
    %c0_52 = arith.constant 0 : index
    %57 = vector.load %arg1[%c0_49, %c1_50, %c0_51, %c0_52] : memref<1x2x12x16xf32, #tpu.memory_space<vmem>>, vector<1x1x8x16xf32>
    %58 = vector.shape_cast %57 : vector<1x1x8x16xf32> to vector<8x16xf32>
    %c0_53 = arith.constant 0 : index
    %c0_54 = arith.constant 0 : index
    %c0_55 = arith.constant 0 : index
    %59 = vector.load %arg2[%c0_53, %c0_54, %c0_55] : memref<3x16x32xf32, #tpu.memory_space<vmem>>, vector<1x16x32xf32>
    %60 = vector.shape_cast %59 : vector<1x16x32xf32> to vector<16x32xf32>
    %cst_56 = arith.constant dense<0.000000e+00> : vector<8x32xf32>
    %61 = tpu.matmul %58, %60, %cst_56 {dimension_numbers = #tpu.dot_dimension_numbers<[1], [0], [0], [1], [0, 0, 1, 1], [], []>} : vector<8x16xf32>, vector<16x32xf32>, vector<8x32xf32> -> vector<8x32xf32>
    %62 = arith.addf %52, %61 : vector<8x32xf32>
    %c0_57 = arith.constant 0 : index
    %c0_58 = arith.constant 0 : index
    %c0_59 = arith.constant 0 : index
    %63 = vector.load %arg4[%c0_57, %c0_58, %c0_59] : memref<3x16x32xf32, #tpu.memory_space<vmem>>, vector<1x16x32xf32>
    %64 = vector.shape_cast %63 : vector<1x16x32xf32> to vector<16x32xf32>
    %cst_60 = arith.constant dense<0.000000e+00> : vector<8x32xf32>
    %65 = tpu.matmul %58, %64, %cst_60 {dimension_numbers = #tpu.dot_dimension_numbers<[1], [0], [0], [1], [0, 0, 1, 1], [], []>} : vector<8x16xf32>, vector<16x32xf32>, vector<8x32xf32> -> vector<8x32xf32>
    %66 = arith.addf %56, %65 : vector<8x32xf32>
    %c0_61 = arith.constant 0 : index
    %c1_62 = arith.constant 1 : index
    %c1_63 = arith.constant 1 : index
    %c0_64 = arith.constant 0 : index
    %67 = vector.load %arg1[%c0_61, %c1_62, %c1_63, %c0_64] : memref<1x2x12x16xf32, #tpu.memory_space<vmem>>, vector<1x1x8x16xf32>
    %68 = vector.shape_cast %67 : vector<1x1x8x16xf32> to vector<8x16xf32>
    %c1_65 = arith.constant 1 : index
    %c0_66 = arith.constant 0 : index
    %c0_67 = arith.constant 0 : index
    %69 = vector.load %arg2[%c1_65, %c0_66, %c0_67] : memref<3x16x32xf32, #tpu.memory_space<vmem>>, vector<1x16x32xf32>
    %70 = vector.shape_cast %69 : vector<1x16x32xf32> to vector<16x32xf32>
    %cst_68 = arith.constant dense<0.000000e+00> : vector<8x32xf32>
    %71 = tpu.matmul %68, %70, %cst_68 {dimension_numbers = #tpu.dot_dimension_numbers<[1], [0], [0], [1], [0, 0, 1, 1], [], []>} : vector<8x16xf32>, vector<16x32xf32>, vector<8x32xf32> -> vector<8x32xf32>
    %72 = arith.addf %62, %71 : vector<8x32xf32>
    %c1_69 = arith.constant 1 : index
    %c0_70 = arith.constant 0 : index
    %c0_71 = arith.constant 0 : index
    %73 = vector.load %arg4[%c1_69, %c0_70, %c0_71] : memref<3x16x32xf32, #tpu.memory_space<vmem>>, vector<1x16x32xf32>
    %74 = vector.shape_cast %73 : vector<1x16x32xf32> to vector<16x32xf32>
    %cst_72 = arith.constant dense<0.000000e+00> : vector<8x32xf32>
    %75 = tpu.matmul %68, %74, %cst_72 {dimension_numbers = #tpu.dot_dimension_numbers<[1], [0], [0], [1], [0, 0, 1, 1], [], []>} : vector<8x16xf32>, vector<16x32xf32>, vector<8x32xf32> -> vector<8x32xf32>
    %76 = arith.addf %66, %75 : vector<8x32xf32>
    %c0_73 = arith.constant 0 : index
    %c1_74 = arith.constant 1 : index
    %c2_75 = arith.constant 2 : index
    %c0_76 = arith.constant 0 : index
    %77 = vector.load %arg1[%c0_73, %c1_74, %c2_75, %c0_76] : memref<1x2x12x16xf32, #tpu.memory_space<vmem>>, vector<1x1x8x16xf32>
    %78 = vector.shape_cast %77 : vector<1x1x8x16xf32> to vector<8x16xf32>
    %c2_77 = arith.constant 2 : index
    %c0_78 = arith.constant 0 : index
    %c0_79 = arith.constant 0 : index
    %79 = vector.load %arg2[%c2_77, %c0_78, %c0_79] : memref<3x16x32xf32, #tpu.memory_space<vmem>>, vector<1x16x32xf32>
    %80 = vector.shape_cast %79 : vector<1x16x32xf32> to vector<16x32xf32>
    %cst_80 = arith.constant dense<0.000000e+00> : vector<8x32xf32>
    %81 = tpu.matmul %78, %80, %cst_80 {dimension_numbers = #tpu.dot_dimension_numbers<[1], [0], [0], [1], [0, 0, 1, 1], [], []>} : vector<8x16xf32>, vector<16x32xf32>, vector<8x32xf32> -> vector<8x32xf32>
    %82 = arith.addf %72, %81 : vector<8x32xf32>
    %c2_81 = arith.constant 2 : index
    %c0_82 = arith.constant 0 : index
    %c0_83 = arith.constant 0 : index
    %83 = vector.load %arg4[%c2_81, %c0_82, %c0_83] : memref<3x16x32xf32, #tpu.memory_space<vmem>>, vector<1x16x32xf32>
    %84 = vector.shape_cast %83 : vector<1x16x32xf32> to vector<16x32xf32>
    %cst_84 = arith.constant dense<0.000000e+00> : vector<8x32xf32>
    %85 = tpu.matmul %78, %84, %cst_84 {dimension_numbers = #tpu.dot_dimension_numbers<[1], [0], [0], [1], [0, 0, 1, 1], [], []>} : vector<8x16xf32>, vector<16x32xf32>, vector<8x32xf32> -> vector<8x32xf32>
    %86 = arith.addf %76, %85 : vector<8x32xf32>
    %87 = arith.negf %86 : vector<8x32xf32>
    %88 = math.exp %87 : vector<8x32xf32>
    %cst_85 = arith.constant 1.000000e+00 : f32
    %89 = vector.broadcast %cst_85 : f32 to vector<8x32xf32>
    %90 = arith.addf %89, %88 : vector<8x32xf32>
    %91 = arith.divf %89, %90 : vector<8x32xf32>
    %92 = arith.addf %82, %91 : vector<8x32xf32>
    %cst_86 = arith.constant 0.000000e+00 : f32
    %93 = vector.broadcast %cst_86 : f32 to vector<8x32xf32>
    %94 = arith.maximumf %92, %93 : vector<8x32xf32>
    %c1_87 = arith.constant 1 : index
    %c0_88 = arith.constant 0 : index
    %c0_89 = arith.constant 0 : index
    %95 = vector.load %arg9[%c1_87, %c0_88, %c0_89] : memref<2x8x32xf32, #tpu.memory_space<vmem>>, vector<1x8x32xf32>
    %96 = vector.shape_cast %95 : vector<1x8x32xf32> to vector<8x32xf32>
    %97 = vector.shape_cast %94 : vector<8x32xf32> to vector<1x8x32xf32>
    tpu.vector_store %arg9[%c1_87, %c0_88, %c0_89], %97 {strides = array<i32>} : memref<2x8x32xf32, #tpu.memory_space<vmem>>, vector<1x8x32xf32>,
    %c0_90 = arith.constant 0 : index
    %c0_91 = arith.constant 0 : index
    %c0_92 = arith.constant 0 : index
    %98 = vector.load %arg9[%c0_90, %c0_91, %c0_92] : memref<2x8x32xf32, #tpu.memory_space<vmem>>, vector<2x8x32xf32>
    %99 = vector.shape_cast %98 : vector<2x8x32xf32> to vector<1x2x8x32xf32>
    %cst_93 = arith.constant dense<0.000000e+00> : vector<1xf32>
    %100 = vector.multi_reduction <add>, %99, %cst_93 [1, 2, 3] : vector<1x2x8x32xf32> to vector<1xf32>
    %101 = vector.shape_cast %100 : vector<1xf32> to vector<1x1x1x1xf32>
    %102 = vector.extract %101[0, 0, 0, 0] : f32 from vector<1x1x1x1xf32>
    %cst_94 = arith.constant 5.120000e+02 : f32
    %103 = arith.divf %102, %cst_94 : f32
    %104 = vector.broadcast %103 : f32 to vector<2x8x32xf32>
    %105 = arith.subf %98, %104 : vector<2x8x32xf32>
    %106 = arith.mulf %105, %105 : vector<2x8x32xf32>
    %107 = vector.shape_cast %106 : vector<2x8x32xf32> to vector<1x2x8x32xf32>
    %cst_95 = arith.constant dense<0.000000e+00> : vector<1xf32>
    %108 = vector.multi_reduction <add>, %107, %cst_95 [1, 2, 3] : vector<1x2x8x32xf32> to vector<1xf32>
    %109 = vector.shape_cast %108 : vector<1xf32> to vector<1x1x1x1xf32>
    %110 = vector.extract %109[0, 0, 0, 0] : f32 from vector<1x1x1x1xf32>
    %cst_96 = arith.constant 5.120000e+02 : f32
    %111 = arith.divf %110, %cst_96 : f32
    %cst_97 = arith.constant 9.99999974E-6 : f32
    %112 = arith.addf %111, %cst_97 : f32
    %113 = math.rsqrt %112 : f32
    %114 = arith.index_cast %arg0 : i32 to index
    %115 = memref.load %arg6[%114] : memref<8xf32, #tpu.memory_space<smem>>
    %116 = arith.index_cast %arg0 : i32 to index
    %117 = memref.load %arg7[%116] : memref<8xf32, #tpu.memory_space<smem>>
    %c0_98 = arith.constant 0 : index
    %c0_99 = arith.constant 0 : index
    %c0_100 = arith.constant 0 : index
    %118 = vector.load %arg9[%c0_98, %c0_99, %c0_100] : memref<2x8x32xf32, #tpu.memory_space<vmem>>, vector<1x8x32xf32>
    %119 = vector.shape_cast %118 : vector<1x8x32xf32> to vector<8x32xf32>
    %120 = vector.broadcast %103 : f32 to vector<8x32xf32>
    %121 = arith.subf %119, %120 : vector<8x32xf32>
    %122 = vector.broadcast %113 : f32 to vector<8x32xf32>
    %123 = arith.mulf %121, %122 : vector<8x32xf32>
    %124 = vector.broadcast %115 : f32 to vector<8x32xf32>
    %125 = arith.mulf %123, %124 : vector<8x32xf32>
    %126 = vector.broadcast %117 : f32 to vector<8x32xf32>
    %127 = arith.addf %125, %126 : vector<8x32xf32>
    %c0_101 = arith.constant 0 : index
    %c0_102 = arith.constant 0 : index
    %c0_103 = arith.constant 0 : index
    %c0_104 = arith.constant 0 : index
    %128 = vector.load %arg8[%c0_101, %c0_102, %c0_103, %c0_104] : memref<2x1x8x32xf32, #tpu.memory_space<vmem>>, vector<1x1x8x32xf32>
    %129 = vector.shape_cast %128 : vector<1x1x8x32xf32> to vector<8x32xf32>
    %130 = vector.shape_cast %127 : vector<8x32xf32> to vector<1x1x8x32xf32>
    tpu.vector_store %arg8[%c0_101, %c0_102, %c0_103, %c0_104], %130 {strides = array<i32>} : memref<2x1x8x32xf32, #tpu.memory_space<vmem>>, vector<1x1x8x32xf32>,
    %c1_105 = arith.constant 1 : index
    %c0_106 = arith.constant 0 : index
    %c0_107 = arith.constant 0 : index
    %131 = vector.load %arg9[%c1_105, %c0_106, %c0_107] : memref<2x8x32xf32, #tpu.memory_space<vmem>>, vector<1x8x32xf32>
    %132 = vector.shape_cast %131 : vector<1x8x32xf32> to vector<8x32xf32>
    %133 = vector.broadcast %103 : f32 to vector<8x32xf32>
    %134 = arith.subf %132, %133 : vector<8x32xf32>
    %135 = vector.broadcast %113 : f32 to vector<8x32xf32>
    %136 = arith.mulf %134, %135 : vector<8x32xf32>
    %137 = vector.broadcast %115 : f32 to vector<8x32xf32>
    %138 = arith.mulf %136, %137 : vector<8x32xf32>
    %139 = vector.broadcast %117 : f32 to vector<8x32xf32>
    %140 = arith.addf %138, %139 : vector<8x32xf32>
    %c1_108 = arith.constant 1 : index
    %c0_109 = arith.constant 0 : index
    %c0_110 = arith.constant 0 : index
    %c0_111 = arith.constant 0 : index
    %141 = vector.load %arg8[%c1_108, %c0_109, %c0_110, %c0_111] : memref<2x1x8x32xf32, #tpu.memory_space<vmem>>, vector<1x1x8x32xf32>
    %142 = vector.shape_cast %141 : vector<1x1x8x32xf32> to vector<8x32xf32>
    %143 = vector.shape_cast %140 : vector<8x32xf32> to vector<1x1x8x32xf32>
    tpu.vector_store %arg8[%c1_108, %c0_109, %c0_110, %c0_111], %143 {strides = array<i32>} : memref<2x1x8x32xf32, #tpu.memory_space<vmem>>, vector<1x1x8x32xf32>,
    return
  }
  func.func @transform_0(%arg0: i32) -> (i32, i32, i32, i32) {
    %c0_i32 = arith.constant 0 : i32
    %c0_i32_0 = arith.constant 0 : i32
    %c0_i32_1 = arith.constant 0 : i32
    %c0_i32_2 = arith.constant 0 : i32
    return %arg0, %c0_i32, %c0_i32_0, %c0_i32_1 : i32, i32, i32, i32
  }
  func.func @transform_1(%arg0: i32) -> (i32, i32, i32) {
    %c0_i32 = arith.constant 0 : i32
    %c0_i32_0 = arith.constant 0 : i32
    %c0_i32_1 = arith.constant 0 : i32
    %c0_i32_2 = arith.constant 0 : i32
    return %c0_i32, %c0_i32_0, %c0_i32_1 : i32, i32, i32
  }
  func.func @transform_2(%arg0: i32) -> (i32, i32) {
    %c0_i32 = arith.constant 0 : i32
    %c0_i32_0 = arith.constant 0 : i32
    %c0_i32_1 = arith.constant 0 : i32
    return %c0_i32, %c0_i32_0 : i32, i32
  }
  func.func @transform_3(%arg0: i32) -> (i32, i32, i32) {
    %c0_i32 = arith.constant 0 : i32
    %c0_i32_0 = arith.constant 0 : i32
    %c0_i32_1 = arith.constant 0 : i32
    %c0_i32_2 = arith.constant 0 : i32
    return %c0_i32, %c0_i32_0, %c0_i32_1 : i32, i32, i32
  }
  func.func @transform_4(%arg0: i32) -> (i32, i32) {
    %c0_i32 = arith.constant 0 : i32
    %c0_i32_0 = arith.constant 0 : i32
    %c0_i32_1 = arith.constant 0 : i32
    return %c0_i32, %c0_i32_0 : i32, i32
  }
  func.func @transform_5(%arg0: i32) -> i32 {
    %c0_i32 = arith.constant 0 : i32
    %c0_i32_0 = arith.constant 0 : i32
    return %c0_i32 : i32
  }
  func.func @transform_6(%arg0: i32) -> i32 {
    %c0_i32 = arith.constant 0 : i32
    %c0_i32_0 = arith.constant 0 : i32
    return %c0_i32 : i32
  }
  func.func @transform_7(%arg0: i32) -> (i32, i32, i32, i32) {
    %c0_i32 = arith.constant 0 : i32
    %c0_i32_0 = arith.constant 0 : i32
    %c0_i32_1 = arith.constant 0 : i32
    %c0_i32_2 = arith.constant 0 : i32
    return %c0_i32, %arg0, %c0_i32_0, %c0_i32_1 : i32, i32, i32, i32
  }
}

</mosaic_0001>

<bundles_post_ra>
// kernel: stgcn_block_forward.4
= control target key start
LH: loop header
LB: loop body
LE: loop exit
PB: predicated region body
PF: predicated region fallthrough
CT: control target
= control target key end

     0   :  { %v181_v1 = vmov 0.0   ;;  %vm15_vm0 = vcmask 64512   ;;  %vm182_vm1 = vmmov 0   ;;  %s219_s1 = inlined_call_operand.vmem [shape: f32[8,384], index: 1, kind: input, shape index: {}]   ;;  %s220_s0 = inlined_call_operand.vmem [shape: f32[8,8], index: 0, kind: input, shape index: {}]   ;;  %s221_s2 = inlined_call_operand.vmem [shape: f32[8,384], index: 2, kind: output, shape index: {}]  }
   0x1   :  { %v13_v0 = vld [vmem:[%s219_s1 + $0x8] sm:$0xff]  ;;  %174 = vmatprep.subr.mxu1 %v181_v1  ;;  %v12_v2 = vld [vmem:[%s219_s1] sm:$0xff]  ;;  %83 = vmatprep.mubr.f32.mxu0 %v181_v1  ;;  %v14_v3 = vld [vmem:[%s219_s1 + $0x10] sm:$0xff] }
   0x2   :  { %49 = vmatprep.subr.mxu0 %v13_v0  ;;  %175 = vmatpush3.msra.mxu1 %v14_v3  ;;  %v11_v4 = vld [vmem:[%s220_s0] sm:$0xff] }
   0x3   :  { %50 = vmatpush1.msra.mxu0 %v12_v2  ;;  %176 = vmatprep.mubr.msk.f32.mxu1 %vm182_vm1, %v181_v1 }
   0x4   :  { %170 = vmatmul.mubr.msk.f32.vlgmr.msra.gmra.mxu0 %vm15_vm0, %v11_v4  ;;  %177 = vmatmul.mubr.msk.f32.vlgmr.msra.gmra.mxu1 %vm15_vm0, %v11_v4 }
  0xc4   :  { %v85_v5 = vpop.f32.mrf.mxu0  ;;  %v156_v6 = vpop.f32.mrf.mxu1 }
  0xc5   :  { %v160_v7 = vmax.f32 %v85_v5, 0.0  ;;  %v162_v8 = vmax.f32 %v156_v6, 0.0 }
  0xc6   :  { %v87_v9 = vpop.f32.mrf.mxu0  ;;  %v178_v10 = vpop.f32.mrf.mxu1 }
  0xc7   :  { %163 = vst [vmem:[%s221_s2] sm:$0xff] %v160_v7  ;;  %165 = vst [vmem:[%s221_s2 + $0x10] sm:$0xff] %v162_v8  ;;  %v161_v11 = vmax.f32 %v87_v9, 0.0 }
  0xc9   :  { %164 = vst [vmem:[%s221_s2 + $0x8] sm:$0xff] %v161_v11 }

// kernel: stgcn_block_forward.5
= control target key start
LH: loop header
LB: loop body
LE: loop exit
PB: predicated region body
PF: predicated region fallthrough
CT: control target
= control target key end

     0   :  { %12 = vsyncpa [#allocation5], 0  ;;  %s2086_s0 = inlined_call_operand.vmem [shape: f32[8,2,12,16], index: 0, kind: input, shape index: {}]   ;;  %s2087_s1 = inlined_call_operand.vmem [shape: f32[3,16,32], index: 1, kind: input, shape index: {}]   ;;  %s2088_s2 = inlined_call_operand.vmem [shape: f32[1,32], index: 2, kind: input, shape index: {}]   ;;  %s2089_s3 = inlined_call_operand.vmem [shape: f32[3,16,32], index: 3, kind: input, shape index: {}]   ;;  %s2090_s4 = inlined_call_operand.vmem [shape: f32[1,32], index: 4, kind: input, shape index: {}]   ;;  %s2091_s5 = inlined_call_operand.vmem [shape: f32[8], index: 5, kind: input, shape index: {}]   ;;  %s2092_s6 = inlined_call_operand.vmem [shape: f32[8], index: 6, kind: input, shape index: {}]   ;;  %s2093_s7 = inlined_call_operand.hbm [shape: f32[2,8,8,32], index: 7, kind: output, shape index: {}]  }
   0x1   :  { %13 = vsyncpa [#allocation7], 0 }
   0x2   :  { %14 = vsyncpa [#allocation4], 0 }
   0x3   :  { %16 = vsyncpa [#allocation4 + $0x1], 0  ;;  %s1821_s24 = smov 0   ;;  %s1823_s25 = smov 0  }
   0x4   :  { %s1825_s26 = smov 0   ;;  %s1827_s27 = smov 0  }
   0x5 LB: > { %s1842_s28 = sadd.s32 4294967295, %s1771_s27   ;;  %s1418_s29 = sadd.s32 4294967294, %s1771_s27   ;;  %s1771_s27 = sphi %s1827_s27, %s2111_s27   ;;  %s1767_s26 = sphi %s1825_s26, %s2110_s26   ;;  %s1763_s25 = sphi %s1823_s25, %s2109_s25   ;;  %s1759_s24 = sphi %s1821_s24, %s2108_s24  }
   0x6   : > { %s1846_s30 = sadd.s32 1, %s1771_s27   ;;  %s181_s8 = sadd.s32 1, %s1767_s26 }
   0x7   : > { %s178_s9 = ssub.s32 %s1771_s27, %s1846_s30  ;;  %p191_p0 = scmp.ne.s32.totalorder %s1767_s26, %s1763_s25 }
   0x8   : > { %p179_p1 = scmp.eq.s32.totalorder %s178_s9, 0  ;;  %p192_p2 = scmp.eq.s32.totalorder %s1842_s28, 7 }
   0x9   : > { %p197_p3 = scmp.ne.s32.totalorder %s1763_s25, %s1759_s24  ;;  %p198_p4 = scmp.eq.s32.totalorder %s1418_s29, 7 }
   0xa   : > { %s1857_s10 = scalar_select %p179_p1, %s1767_s26, %s181_s8  }
   0xb   : > { %p1859_p5 = por %p192_p2, %p191_p0  ;;  %p1863_p6 = por %p198_p4, %p197_p3 }
   0xc   : > { %p1419_p7 = scmp.ge.s32.totalorder %s1771_s27, 1  ;;  %p205_p8 = scmp.lt.s32.totalorder %s1771_s27, 9 }
   0xd   : > { %s2097_s11 = scalar_select %p1859_p5, 1, 0 }
   0xe   : > { %s2098_s12 = scalar_select %p1863_p6, 1, 0 }
   0xf   : > { %p2094_p9 = scmp.eq.s32.totalorder %s1842_s28, 0  ;;  %p1870_p10 = pnand %p1419_p7, %p205_p8 }
  0x10   : > { %s230_s16 = sshll.u32 %s2091_s5, 4  ;;  %s241_s19 = sshll.u32 %s2092_s6, 4  ;;  %s231_s16 = int_to_ptr.vmem [resolvable:$true] %s230_s16  ;;  %s242_s19 = int_to_ptr.vmem [resolvable:$true] %s241_s19 }
  0x11   : > { %s2099_s13 = scalar_select %p1870_p10, 1, 0 }
  0x12   : > { %p1608_p11 = pneg %p1870_p10  ;;  %s1673_s21 = scalar_lea.vmem %s231_s16, 16 }
  0x13   : > { %p1674_p13 = scmp.ne.s32.totalorder %s231_s16, %s1673_s21  ;;  %p1681_p3 = scmp.lt.s32.totalorder %s231_s16, %s231_s16 }
  0x14   : > { %p1884_p12 = pnand %p2094_p9, %p1608_p11  ;;  %p1682_p4 = scmp.lt.s32.totalorder %s1673_s21, %s1673_s21 }
  0x16   : > { %p1675_p0 = pneg %p1884_p12  ;;  %p1683_p7 = por %p1682_p4, %p1681_p3 }
  0x18   : > { %p1676_p1 = pnand %p1675_p0, %p1674_p13 }
  0x1a   : > { %p1677_p2 = pneg %p1676_p1 }
  0x1c   : > { %p1684_p8 = pnand %p1683_p7, %p1677_p2 }
  0x1e   : > { %1687 = shalt.err (!%p1684_p8)
}
  0x1f   : > { %s1773_s22 = smov [#allocation3]   ;;  %s1688_s23 = scalar_lea.vmem %s242_s19, 16 }
  0x20   : > { %1611 = dma.vmem_to_smem (!%p1884_p12), %s231_s16, 16, %s1773_s22, [#allocation5]  }
  0x21   : > { %p1689_p11 = scmp.ne.s32.totalorder %s242_s19, %s1688_s23  ;;  %p1696_p5 = scmp.lt.s32.totalorder %s242_s19, %s242_s19 }
  0x22   : > { %p1697_p10 = scmp.lt.s32.totalorder %s1688_s23, %s1688_s23 }
  0x23   : > { %p1691_p9 = pnand %p1689_p11, %p1675_p0 }
  0x24   : > { %p1698_p13 = por %p1697_p10, %p1696_p5 }
  0x25   : > { %p1692_p6 = pneg %p1691_p9 }
  0x27   : > { %p1699_p1 = pnand %p1698_p13, %p1692_p6 }
  0x29   : > { %1702 = shalt.err (!%p1699_p1)
}
  0x2a   : > { %s1774_s29 = smov [#allocation6]   ;;  %p2101_p2 = scmp.ne.s32.totalorder %s2099_s13, 0 }
  0x2b   : > { %1614 = dma.vmem_to_smem (!%p1884_p12), %s242_s19, 16, %s1774_s29, [#allocation7]  }
  0x2c   : > { %262 = sbr.rel (%p2101_p2) target bundleno = 826 (0x33a), region = 48  ;;  %p2102_p3 = scmp.eq.s32.totalorder (!%p2101_p2), %s1842_s28, 0 }
  0x31   : > { %1746 = dma.done.wait (%p2102_p3), [#allocation5], 16   ;;  %p2103_p4 = pmov %p2102_p3 }
  0x32   : > { %p2104_p9 = pmov %p2102_p3 }
  0x33   : > { %1748 = vsyncadd (%p2103_p4), [#allocation5], 4294967280 }
  0x34   : > { %1750 = dma.done.wait (%p2104_p9), [#allocation7], 16   ;;  %p2105_p5 = pmov %p2102_p3 }
  0x36   : > { %1752 = vsyncadd (%p2105_p5), [#allocation7], 4294967280 }
  0x37   : > { %272 = sfence }
  0x38   : > { %v399_v0 = vld [vmem:[%s2089_s3 + $0x8] sm:$0xff]  ;;  %p299_p6 = scmp.lt.s32.totalorder %s1842_s28, 7  ;;  %v1775_v1 = vmov 0.0   ;;  %v398_v2 = vld [vmem:[%s2089_s3] sm:$0xff]  ;;  %vm1776_vm0 = vmmov 0   ;;  %vm323_vm1 = vcmask 130048  }
  0x39   : > { %1515 = vmatprep.subr.mxu1 %v1775_v1  ;;  %1519 = vmatprep.mubr.msk.f32.mxu1 %vm1776_vm0, %v1775_v1  ;;  %v1919_v3 = vld [vmem:[%s2087_s1 + $0x8] sm:$0xff]  ;;  %v1924_v4 = vld [vmem:[%s2087_s1] sm:$0xff]  ;;  %v1437_v5 = vld [vmem:[%s2089_s3 + $0x18] sm:$0xff]  ;;  %vm783_vm2 = vcmask 261120   ;;  %s296_s21 = sand.u32 1, %s1763_s25   ;;  %s1303_s22 = sld [smem:[#allocation3 + %s1842_s28]] }
  0x3a   : > { %1516 = vmatpush3.msra.mxu1 %v399_v0  ;;  %s300_s15 = scalar_select %p299_p6, %s1842_s28, 7  ;;  %1508 = vmatprep.subr.mxu0 %v1775_v1  ;;  %v1434_v7 = vld [vmem:[%s2087_s1 + $0x18] sm:$0xff]  ;;  %v1436_v8 = vld [vmem:[%s2089_s3 + $0x10] sm:$0xff]  ;;  %v1443_v10 = vld [vmem:[%s2089_s3 + $0x28] sm:$0xff] }
  0x3b   : > { %1517 = vmatprep.subr.mxu1 %v1775_v1  ;;  %1509 = vmatpush3.msra.mxu0 %v1919_v3  ;;  %v1433_v11 = vld [vmem:[%s2087_s1 + $0x10] sm:$0xff]  ;;  %v1442_v12 = vld [vmem:[%s2089_s3 + $0x20] sm:$0xff]  ;;  %v1440_v15 = vld [vmem:[%s2087_s1 + $0x28] sm:$0xff]  ;;  %s1426_s29 = sshll.u32 %s296_s21, 4  ;;  %s1304_s8 = sld [smem:[#allocation6 + %s1842_s28]] }
  0x3c   : > { %1518 = vmatpush3.msra.mxu1 %v398_v2  ;;  %s1471_s20 = sshll.u32 %s300_s15, 5  ;;  %1510 = vmatprep.subr.mxu0 %v1775_v1  ;;  %v1439_v17 = vld [vmem:[%s2087_s1 + $0x20] sm:$0xff]  ;;  %s1468_s14 = sshll.u32 %s1842_s28, 7 }
  0x3d   : > { %1529 = vmatprep.subr.mxu1 %v1775_v1  ;;  %s1933_s23 = scalar_lea.vmem %s2086_s0, %s1471_s20  ;;  %1511 = vmatpush3.msra.mxu0 %v1924_v4  ;;  %v1430_v21 = vld [vmem:[%s2090_s4] ss:$0 sm:$0xff]  ;;  %s2046_s28 = scalar_lea.sflag [#allocation4], %s296_s21 }
  0x3e   : > { %v320_v6 = vld [vmem:[%s1933_s23] sm:$0xff]  ;;  %1512 = vmatprep.mubr.msk.f32.mxu0 %vm1776_vm0, %v1775_v1  ;;  %1522 = vmatprep.subr.mxu0 %v1775_v1  ;;  %v1448_v14 = vld [vmem:[%s1933_s23 + $0x10] sm:$0xff]  ;;  %p2106_p12 = scmp.ne.s32.totalorder %s2097_s11, 0 }
  0x3f   : > { %1520 = vmatmul.mubr.msk.f32.vlgmr.msra.gmra.mxu1 %vm323_vm1, %v320_v6  ;;  %1513 = vmatmul.mubr.msk.f32.vlgmr.msra.gmra.mxu0 %vm323_vm1, %v320_v6  ;;  %v471_v9 = vld [vmem:[%s1933_s23 + $0x1] sm:$0xff]  ;;  %v1451_v16 = vld [vmem:[%s1933_s23 + $0x11] sm:$0xff]  ;;  %v1429_v51 = vld [vmem:[%s2088_s2] ss:$0 sm:$0xff] }
  0x40   : > { %1530 = vmatpush3.msra.mxu1 %v1437_v5  ;;  %1533 = vmatprep.mubr.msk.f32.mxu1 %vm1776_vm0, %v1775_v1  ;;  %v623_v13 = vld [vmem:[%s1933_s23 + $0x2] sm:$0xff]  ;;  %v1458_v18 = vld [vmem:[%s1933_s23 + $0x12] sm:$0xff]  ;;  %s298_s23 = scalar_lea.vmem [#allocation8], %s1426_s29 }
  0x41   : > { %1531 = vmatprep.subr.mxu1 %v1775_v1  ;;  %1523 = vmatpush3.msra.mxu0 %v1434_v7  ;;  %s1334_s13 = sshll.u32 %s298_s23, 4  ;;  %s2037_s13 = int_to_ptr.vmem [resolvable:$true] %s1334_s13 }
  0x42   : > { %1532 = vmatpush3.msra.mxu1 %v1436_v8  ;;  %1524 = vmatprep.subr.mxu0 %v1775_v1 }
  0x43   : > { %1543 = vmatprep.subr.mxu1 %v1775_v1  ;;  %1534 = vmatmul.mubr.msk.f32.vlgmr.msra.gmra.mxu1 %vm323_vm1, %v471_v9 }
  0x44   : > { %1544 = vmatpush3.msra.mxu1 %v1443_v10  ;;  %1547 = vmatprep.mubr.msk.f32.mxu1 %vm1776_vm0, %v1775_v1 }
  0x45   : > { %1545 = vmatprep.subr.mxu1 %v1775_v1  ;;  %1525 = vmatpush3.msra.mxu0 %v1433_v11 }
  0x46   : > { %1546 = vmatpush3.msra.mxu1 %v1442_v12  ;;  %1526 = vmatprep.mubr.msk.f32.mxu0 %vm1776_vm0, %v1775_v1 }
  0x47   : > { %1557 = vmatprep.subr.mxu1 %v1775_v1  ;;  %1548 = vmatmul.mubr.msk.f32.vlgmr.msra.gmra.mxu1 %vm323_vm1, %v623_v13 }
  0x48   : > { %1558 = vmatpush3.msra.mxu1 %v399_v0  ;;  %1561 = vmatprep.mubr.msk.f32.mxu1 %vm1776_vm0, %v1775_v1 }
  0x49   : > { %1559 = vmatprep.subr.mxu1 %v1775_v1  ;;  %1527 = vmatmul.mubr.msk.f32.vlgmr.msra.gmra.mxu0 %vm323_vm1, %v471_v9 }
  0x4a   : > { %1560 = vmatpush3.msra.mxu1 %v398_v2  ;;  %1536 = vmatprep.subr.mxu0 %v1775_v1 }
  0x4b   : > { %1571 = vmatprep.subr.mxu1 %v1775_v1  ;;  %1562 = vmatmul.mubr.msk.f32.vlgmr.msra.gmra.mxu1 %vm323_vm1, %v1448_v14 }
  0x4c   : > { %1572 = vmatpush3.msra.mxu1 %v1437_v5  ;;  %1575 = vmatprep.mubr.msk.f32.mxu1 %vm1776_vm0, %v1775_v1 }
  0x4d   : > { %1573 = vmatprep.subr.mxu1 %v1775_v1  ;;  %1537 = vmatpush3.msra.mxu0 %v1440_v15 }
  0x4e   : > { %1574 = vmatpush3.msra.mxu1 %v1436_v8  ;;  %1538 = vmatprep.subr.mxu0 %v1775_v1 }
  0x4f   : > { %1585 = vmatprep.subr.mxu1 %v1775_v1  ;;  %1576 = vmatmul.mubr.msk.f32.vlgmr.msra.gmra.mxu1 %vm323_vm1, %v1451_v16 }
  0x50   : > { %1586 = vmatpush3.msra.mxu1 %v1443_v10  ;;  %1589 = vmatprep.mubr.msk.f32.mxu1 %vm1776_vm0, %v1775_v1 }
  0x51   : > { %1587 = vmatprep.subr.mxu1 %v1775_v1  ;;  %1539 = vmatpush3.msra.mxu0 %v1439_v17 }
  0x52   : > { %1588 = vmatpush3.msra.mxu1 %v1442_v12  ;;  %1540 = vmatprep.mubr.msk.f32.mxu0 %vm1776_vm0, %v1775_v1 }
  0x53   : > { %1590 = vmatmul.mubr.msk.f32.vlgmr.msra.gmra.mxu1 %vm323_vm1, %v1458_v18  ;;  %1541 = vmatmul.mubr.msk.f32.vlgmr.msra.gmra.mxu0 %vm323_vm1, %v623_v13 }
  0x54   : > { %1550 = vmatprep.subr.mxu0 %v1775_v1  ;;  %1554 = vmatprep.mubr.msk.f32.mxu0 %vm1776_vm0, %v1775_v1 }
  0x55   : > { %1551 = vmatpush3.msra.mxu0 %v1919_v3 }
  0x56   : > { %1552 = vmatprep.subr.mxu0 %v1775_v1 }
  0x57   : > { %1553 = vmatpush3.msra.mxu0 %v1924_v4 }
  0x58   : > { %1555 = vmatmul.mubr.msk.f32.vlgmr.msra.gmra.mxu0 %vm323_vm1, %v1448_v14  ;;  %1564 = vmatprep.subr.mxu0 %v1775_v1 }
  0x59   : > { %1565 = vmatpush3.msra.mxu0 %v1434_v7  ;;  %1568 = vmatprep.mubr.msk.f32.mxu0 %vm1776_vm0, %v1775_v1 }
  0x5a   : > { %1566 = vmatprep.subr.mxu0 %v1775_v1 }
  0x5b   : > { %1567 = vmatpush3.msra.mxu0 %v1433_v11 }
  0x5c   : > { %1569 = vmatmul.mubr.msk.f32.vlgmr.msra.gmra.mxu0 %vm323_vm1, %v1451_v16  ;;  %1578 = vmatprep.subr.mxu0 %v1775_v1 }
  0x5d   : > { %1579 = vmatpush3.msra.mxu0 %v1440_v15  ;;  %1582 = vmatprep.mubr.msk.f32.mxu0 %vm1776_vm0, %v1775_v1 }
  0x5e   : > { %1580 = vmatprep.subr.mxu0 %v1775_v1 }
  0x5f   : > { %1581 = vmatpush3.msra.mxu0 %v1439_v17 }
  0x60   : > { %1583 = vmatmul.mubr.msk.f32.vlgmr.msra.gmra.mxu0 %vm323_vm1, %v1458_v18 }
  0xff   : > { %v466_v19 = vpop.f32.mrf.mxu1  ;;  %v393_v20 = vpop.f32.mrf.mxu0 }
 0x100   : > { %v470_v25 = vadd.f32 %v1430_v21, %v466_v19  ;;  %v397_v53 = vadd.f32 %v1429_v51, %v393_v20 }
 0x101   : > { %v1521_v22 = vpop.f32.mrf.mxu1  ;;  %v1514_v23 = vpop.f32.mrf.mxu0 }
 0x103   : > { %v618_v24 = vpop.f32.mrf.mxu1 }
 0x104   : > { %v622_v27 = vadd.f32 %v618_v24, %v470_v25 }
 0x105   : > { %v1535_v26 = vpop.f32.mrf.mxu1 }
 0x107   : > { %v770_v28 = vpop.f32.mrf.mxu1 }
 0x108   : > { %v774_v29 = vadd.f32 %v770_v28, %v622_v27 }
 0x109   : > { %v1549_v30 = vpop.f32.mrf.mxu1  ;;  %v544_v31 = vpop.f32.mrf.mxu0 }
 0x10a   : > { %v1445_v32 = vmul.f32 -1.442695, %v774_v29  ;;  %v548_v56 = vadd.f32 %v544_v31, %v397_v53 }
 0x10b   : > { %v947_v33 = vpop.f32.mrf.mxu1  ;;  %v1528_v34 = vpop.f32.mrf.mxu0 }
 0x10c   : > { %1663 = vpow2.f32 %v1445_v32  ;;  %v951_v37 = vadd.f32 %v1430_v21, %v947_v33 }
 0x10d   : > { %v1563_v35 = vpop.f32.mrf.mxu1 }
 0x10e   : > { %v1309_v35 = vstv %s1303_s22 }
 0x10f   : > { %v1097_v36 = vpop.f32.mrf.mxu1 }
 0x110   : > { %v1101_v39 = vadd.f32 %v1097_v36, %v951_v37 }
 0x111   : > { %v1577_v38 = vpop.f32.mrf.mxu1 }
 0x112   : > { %v1311_v38 = vstv %s1304_s8 }
 0x113   : > { %v1247_v40 = vpop.f32.mrf.mxu1  ;;  %v696_v41 = vpop.f32.mrf.mxu0 }
 0x114   : > { %v1251_v42 = vadd.f32 %v1247_v40, %v1101_v39  ;;  %v700_v59 = vadd.f32 %v696_v41, %v548_v56 }
 0x115   : > { %v1591_v43 = vpop.f32.mrf.mxu1  ;;  %v1542_v44 = vpop.f32.mrf.mxu0 }
 0x116   : > { %v1465_v45 = vmul.f32 -1.442695, %v1251_v42 }
 0x118   : > { %1665 = vpow2.f32 %v1465_v45  ;;  %v874_v46 = vpop.f32.mrf.mxu0 }
 0x119   : > { %v1664_v47 = vpop.eup %1663  ;;  %v878_v63 = vadd.f32 %v1429_v51, %v874_v46 }
 0x11a   : > { %v778_v48 = vadd.f32 1.0, %v1664_v47  ;;  %v1556_v49 = vpop.f32.mrf.mxu0 }
 0x11c   : > { %1667 = vrcp.f32 %v778_v48  ;;  %v1024_v50 = vpop.f32.mrf.mxu0 }
 0x11d   : > { %v1028_v0 = vadd.f32 %v1024_v50, %v878_v63 }
 0x11e   : > { %v1570_v52 = vpop.f32.mrf.mxu0 }
 0x120   : > { %v1174_v54 = vpop.f32.mrf.mxu0 }
 0x121   : > { %v1178_v1 = vadd.f32 %v1174_v54, %v1028_v0 }
 0x122   : > { %v1584_v55 = vpop.f32.mrf.mxu0 }
 0x125   : > { %v1666_v57 = vpop.eup %1665 }
 0x126   : > { %v1255_v58 = vadd.f32 1.0, %v1666_v57 }
 0x128   : > { %1669 = vrcp.f32 %v1255_v58 }
 0x129   : > { %v1668_v60 = vpop.eup %1667 }
 0x12a   : > { %v781_v61 = vadd.f32 %v1668_v60, %v700_v59 }
 0x12c   : > { %v782_v62 = vmax.f32 %v781_v61, 0.0 }
 0x12e   : > { %784 = vst.msk [vmem:[#allocation2] sm:$0xff] %vm783_vm2, %v782_v62 }
 0x135   : > { %v1670_v2 = vpop.eup %1669  ;;  %v1262_v5 = vld [vmem:[#allocation2] sm:$0xff] }
 0x136   : > { %v1258_v3 = vadd.f32 %v1670_v2, %v1178_v1  ;;  %v1264_v7 = vsel %vm783_vm2, %v1262_v5, 0.0 }
 0x138   : > { %v1259_v4 = vmax.f32 %v1258_v3, 0.0 }
 0x13a   : > { %1261 = vst.msk [vmem:[#allocation2 + $0x8] sm:$0xff] %vm783_vm2, %v1259_v4 }
 0x141   : > { %v1263_v6 = vld [vmem:[#allocation2 + $0x8] sm:$0xff] }
 0x142   : > { %v1265_v8 = vsel %vm783_vm2, %v1263_v6, 0.0 }
 0x143   : > { %v1266_v9 = vadd.f32 %v1265_v8, %v1264_v7 }
 0x145   : > { %1267 = vadd.xlane.f32.xlu0 %v1266_v9 }
 0x1ce   : > { %v1268_v10 = vpop.xlane.xlu0 %1267 }
 0x1cf   : > { %v1269_v11 = vrot.slane %v1268_v10, 4 }
 0x1d1   : > { %v1270_v12 = vadd.f32 %v1269_v11, %v1268_v10 }
 0x1d3   : > { %v1271_v13 = vrot.slane %v1270_v12, 2 }
 0x1d5   : > { %v1272_v14 = vadd.f32 %v1271_v13, %v1270_v12 }
 0x1d7   : > { %v1273_v15 = vrot.slane %v1272_v14, 1 }
 0x1d9   : > { %v1274_v16 = vadd.f32 %v1273_v15, %v1272_v14 }
 0x1db   : > { %1592 = vpush %v1274_v16 }
 0x20c   : > { %s1593_s16 = spop %1592 }
 0x20d   : > { %s1278_s17 = smul.f32 0.001953125, %s1593_s16 }
 0x20f   : > { %v1279_v17 = vstv %s1278_s17  ;;  %s2042_s17 = scalar_lea.hbm %s2093_s7, %s1468_s14 }
 0x210   : > { %v1280_v18 = vsub.f32 %v1262_v5, %v1279_v17  ;;  %v1281_v19 = vsub.f32 %v1263_v6, %v1279_v17 }
 0x212   : > { %v1282_v20 = vmul.f32 %v1280_v18, %v1280_v18  ;;  %v1283_v21 = vmul.f32 %v1281_v19, %v1281_v19 }
 0x214   : > { %v1284_v22 = vsel %vm783_vm2, %v1282_v20, 0.0  ;;  %v1285_v23 = vsel %vm783_vm2, %v1283_v21, 0.0 }
 0x215   : > { %v1286_v24 = vadd.f32 %v1285_v23, %v1284_v22 }
 0x217   : > { %1287 = vadd.xlane.f32.xlu0 %v1286_v24 }
 0x2a0   : > { %v1288_v25 = vpop.xlane.xlu0 %1287 }
 0x2a1   : > { %v1289_v26 = vrot.slane %v1288_v25, 4 }
 0x2a3   : > { %v1290_v27 = vadd.f32 %v1289_v26, %v1288_v25 }
 0x2a5   : > { %v1291_v28 = vrot.slane %v1290_v27, 2 }
 0x2a7   : > { %v1292_v29 = vadd.f32 %v1291_v28, %v1290_v27 }
 0x2a9   : > { %v1293_v30 = vrot.slane %v1292_v29, 1 }
 0x2ab   : > { %v1294_v31 = vadd.f32 %v1293_v30, %v1292_v29 }
 0x2ad   : > { %1594 = vpush %v1294_v31 }
 0x2de   : > { %s1595_s18 = spop %1594 }
 0x2df   : > { %s1298_s19 = smul.f32 0.001953125, %s1595_s18  ;;  %s1703_s18 = scalar_lea.vmem %s2037_s13, 256 }
 0x2e0   : > { %p1704_p10 = scmp.ne.s32.totalorder %s2037_s13, %s1703_s18 }
 0x2e1   : > { %s1299_s20 = sadd.f32 1e-05, %s1298_s19  ;;  %s1777_s19 = smov [#allocation8]  }
 0x2e2   : > { %p1705_p0 = pnand %p1704_p10, %p2106_p12 }
 0x2e3   : > { %v1300_v32 = vstv %s1299_s20  ;;  %s1707_s20 = sshll.u32 %s1777_s19, 4  ;;  %s1708_s20 = int_to_ptr.vmem [resolvable:$false] %s1707_s20 }
 0x2e4   : > { %1671 = vrsqrt.f32 %v1300_v32  ;;  %p1706_p7 = pneg %p1705_p0  ;;  %s1709_s22 = scalar_lea.vmem %s1708_s20, 512 }
 0x2e5   : > { %p1710_p8 = scmp.lt.s32.totalorder %s2037_s13, %s1708_s20  ;;  %p1711_p11 = scmp.lt.s32.totalorder %s1709_s22, %s1703_s18 }
 0x2e7   : > { %p1712_p13 = por %p1711_p11, %p1710_p8 }
 0x2e9   : > { %p1713_p1 = pnand %p1712_p13, %p1706_p7 }
 0x2f1   : > { %v1672_v33 = vpop.eup %1671 }
 0x2f2   : > { %1596 = vpush %v1672_v33 }
 0x323   : > { %s1597_s9 = spop %1596 }
 0x324   : > { %v1307_v34 = vstv %s1597_s9 }
 0x325   : > { %v1308_v36 = vmul.f32 %v1307_v34, %v1280_v18  ;;  %v1316_v37 = vmul.f32 %v1307_v34, %v1281_v19 }
 0x327   : > { %v1310_v39 = vmul.f32 %v1309_v35, %v1308_v36  ;;  %v1317_v40 = vmul.f32 %v1316_v37, %v1309_v35 }
 0x329   : > { %v1312_v41 = vadd.f32 %v1311_v38, %v1310_v39  ;;  %v1318_v42 = vadd.f32 %v1317_v40, %v1311_v38 }
 0x32b   : > { %1313 = vst.msk [vmem:[%s298_s23] sm:$0xff] %vm783_vm2, %v1312_v41  ;;  %1466 = vst.msk [vmem:[%s298_s23 + $0x8] sm:$0xff] %vm783_vm2, %v1318_v42 }
 0x32c   : > { %1716 = shalt.err (!%p1713_p1)
}
 0x32d   : > { %s1717_s21 = scalar_lea.hbm %s2042_s17, 256  ;;  %s1721_s9 = scalar_lea.hbm %s2093_s7, 2048 }
 0x32e   : > { %p1718_p2 = scmp.ne.s32.totalorder %s2042_s17, %s1717_s21  ;;  %p1722_p9 = scmp.lt.s32.totalorder %s2042_s17, %s2093_s7 }
 0x32f   : > { %p1723_p5 = scmp.lt.s32.totalorder %s1721_s9, %s1717_s21 }
 0x330   : > { %p1719_p3 = pnand %p1718_p2, %p2106_p12 }
 0x331   : > { %p1724_p6 = por %p1723_p5, %p1722_p9 }
 0x332   : > { %p1720_p4 = pneg %p1719_p3 }
 0x334   : > { %p1725_p10 = pnand %p1724_p6, %p1720_p4 }
 0x336   : > { %1728 = shalt.err (!%p1725_p10)
}
 0x337   : > { %s1778_s15 = smov 128   ;;  %s1779_s16 = smov 1024  }
 0x338   : > { %s1780_s18 = smov 8  }
 0x339   : > { %1606 = dma.vmem_to_hbm [thread:$0]  (%p2106_p12), %s2037_s13, 256, %s2042_s17, %s2046_s28, %s1778_s15, %s1779_s16, %s1780_s18  }
 0x33a PF: > { %p1623_p0 = scmp.ge.s32.totalorder %s1771_s27, 2  ;;  %s1349_s19 = sand.u32 1, %s1759_s24  }
 0x33b   : > { %p2107_p7 = scmp.ne.s32.totalorder %s2098_s12, 0  ;;  %s1350_s20 = scalar_lea.sflag [#allocation4], %s1349_s19 }
 0x33d   : > { %p1616_p8 = pnand %p1623_p0, %p2107_p7 }
 0x33f   : > { %p1617_p11 = pneg %p1616_p8 }
 0x341   : > { %1754 = dma.done.wait (%p1617_p11), %s1350_s20, 256  }
 0x342   : > { %1756 = vsyncadd (%p1617_p11), %s1350_s20, 4294967040  ;;  %p19_p13 = scmp.ge.s32.totalorder %s1846_s30, 10   ;;  %s2108_s24 = smov %s1763_s25 }
 0x343   : > { %s2109_s25 = smov %s1767_s26  ;;  %s2110_s26 = smov %s1857_s10 }
 0x344   : > { %s2111_s27 = smov %s1846_s30  ;;  %21 = sbr.rel (!%p19_p13) target bundleno = 5 (0x5), region = 99 }
 0x349   :  { %1355 = vsyncpa [#allocation4], 1 }
 0x34a   :  { %1357 = vsyncpa [#allocation4 + $0x1], 1 }
 0x34b   :  { %1358 = vsyncpa [#allocation5], 1 }
 0x34c   :  { %1360 = vsyncpa [#allocation5 + $0x1], 1 }
 0x34d   :  { %1361 = vsyncpa [#allocation7], 1 }

// kernel: stgcn_block_forward.3
= control target key start
LH: loop header
LB: loop body
LE: loop exit
PB: predicated region body
PF: predicated region fallthrough
CT: control target
= control target key end

     0   :  { %vm137_vm0 = vcmask 1043456   ;;  %vm64_vm1 = vcmask 31744   ;;  %vm1807_vm2 = vcmask 261120   ;;  %vm2091_vm3 = vcmask 123904   ;;  %s4024_s1 = inlined_call_operand.vmem [shape: f32[3,4,32], index: 1, kind: input, shape index: {}]   ;;  %s4025_s0 = inlined_call_operand.vmem [shape: f32[192,4], index: 0, kind: input, shape index: {}]   ;;  %s4026_s3 = inlined_call_operand.vmem [shape: f32[3,4,32], index: 3, kind: input, shape index: {}]   ;;  %s4027_s5 = inlined_call_operand.vmem [shape: f32[32,16], index: 5, kind: input, shape index: {}]   ;;  %s4028_s4 = inlined_call_operand.vmem [shape: f32[1,32], index: 4, kind: input, shape index: {}]   ;;  %s4029_s2 = inlined_call_operand.vmem [shape: f32[1,32], index: 2, kind: input, shape index: {}]   ;;  %s4030_s6 = inlined_call_operand.vmem [shape: f32[192,16], index: 6, kind: output, shape index: {}]  }
   0x1   :  { %v63_v0 = vld [vmem:[%s4024_s1] sm:$0xf]  ;;  %v2904_v3 = vld [vmem:[%s4025_s0 + $0x8] sm:$0xff]  ;;  %v41_v6 = vld [vmem:[%s4025_s0 + $0x10] sm:$0xff]  ;;  %vm2065_vm4 = vcmask 130048   ;;  %vm2089_vm5 = vcmask 128000  }
   0x2   :  { %v2892_v1 = vld [vmem:[%s4025_s0] sm:$0xff]  ;;  %2479 = vmatprep.subr.msk.mxu0 %vm137_vm0, %v63_v0  ;;  %2751 = vmatprep.subr.msk.mxu1 %vm137_vm0, %v63_v0  ;;  %v2909_v4 = vld [vmem:[%s4025_s0 + $0x68] sm:$0xff]  ;;  %v2926_v7 = vld [vmem:[%s4025_s0 + $0x70] sm:$0xff] }
   0x3   :  { %v2897_v2 = vld [vmem:[%s4025_s0 + $0x60] sm:$0xff]  ;;  %2480 = vmatpush3.msk.msra.mxu0 %vm137_vm0, %v63_v0  ;;  %2752 = vmatpush3.msk.msra.mxu1 %vm137_vm0, %v63_v0  ;;  %v42_v8 = vld [vmem:[%s4025_s0 + $0x18] sm:$0xff]  ;;  %v44_v13 = vld [vmem:[%s4025_s0 + $0x28] sm:$0xff] }
   0x4   :  { %v350_v5 = vld [vmem:[%s4026_s3] sm:$0xf]  ;;  %2481 = vmatprep.mubr.msk.f32.mxu0 %vm64_vm1, %v2892_v1  ;;  %2499 = vmatprep.mubr.msk.f32.mxu1 %vm64_vm1, %v2897_v2  ;;  %v2940_v9 = vld [vmem:[%s4025_s0 + $0x78] sm:$0xff]  ;;  %v2149_v12 = vld [vmem:[%s4024_s1 + $0x4] sm:$0xf] }
   0x5   :  { %2482 = vmatmul.mubr.msk.f32.vlgmr.msra.gmra.mxu0 %vm64_vm1, %v2904_v3  ;;  %2500 = vmatmul.mubr.msk.f32.vlgmr.msra.gmra.mxu1 %vm64_vm1, %v2909_v4  ;;  %v43_v10 = vld [vmem:[%s4025_s0 + $0x20] sm:$0xff]  ;;  %v2968_v14 = vld [vmem:[%s4025_s0 + $0x88] sm:$0xff]  ;;  %v45_v16 = vld [vmem:[%s4025_s0 + $0x30] sm:$0xff] }
   0x6   :  { %2517 = vmatprep.subr.msk.mxu1 %vm137_vm0, %v350_v5  ;;  %2484 = vmatprep.mubr.msk.f32.mxu0 %vm64_vm1, %v41_v6  ;;  %v2951_v11 = vld [vmem:[%s4025_s0 + $0x80] sm:$0xff]  ;;  %v2979_v17 = vld [vmem:[%s4025_s0 + $0x90] sm:$0xff]  ;;  %v46_v18 = vld [vmem:[%s4025_s0 + $0x38] sm:$0xff] }
   0x7   :  { %2518 = vmatpush3.msk.msra.mxu1 %vm137_vm0, %v350_v5  ;;  %2502 = vmatprep.mubr.msk.f32.mxu1 %vm64_vm1, %v2926_v7  ;;  %v2175_v15 = vld [vmem:[%s4026_s3 + $0x4] sm:$0xf]  ;;  %v2996_v19 = vld [vmem:[%s4025_s0 + $0x98] sm:$0xff]  ;;  %v48_v22 = vld [vmem:[%s4025_s0 + $0x48] sm:$0xff] }
   0x8   :  { %2555 = vmatprep.subr.msk.mxu0 %vm137_vm0, %v2149_v12  ;;  %2593 = vmatprep.subr.msk.mxu1 %vm137_vm0, %v2175_v15  ;;  %v47_v20 = vld [vmem:[%s4025_s0 + $0x40] sm:$0xff]  ;;  %v3018_v23 = vld [vmem:[%s4025_s0 + $0xa8] sm:$0xff]  ;;  %v49_v25 = vld [vmem:[%s4025_s0 + $0x50] sm:$0xff] }
   0x9   :  { %2485 = vmatmul.mubr.msk.f32.gmra.mxu0 %vm64_vm1, %v42_v8  ;;  %2503 = vmatmul.mubr.msk.f32.gmra.mxu1 %vm64_vm1, %v2940_v9  ;;  %v3004_v21 = vld [vmem:[%s4025_s0 + $0xa0] sm:$0xff]  ;;  %v2201_v24 = vld [vmem:[%s4024_s1 + $0x8] sm:$0xf]  ;;  %v3029_v26 = vld [vmem:[%s4025_s0 + $0xb0] sm:$0xff] }
   0xa   :  { %2487 = vmatprep.mubr.msk.f32.mxu0 %vm64_vm1, %v43_v10  ;;  %2505 = vmatprep.mubr.msk.f32.mxu1 %vm64_vm1, %v2951_v11  ;;  %v50_v27 = vld [vmem:[%s4025_s0 + $0x58] sm:$0xff]  ;;  %v3049_v29 = vld [vmem:[%s4025_s0 + $0x1] sm:$0xff]  ;;  %v3061_v30 = vld [vmem:[%s4025_s0 + $0x9] sm:$0xff] }
   0xb   :  { %2556 = vmatpush3.msk.msra.mxu0 %vm137_vm0, %v2149_v12  ;;  %v3044_v28 = vld [vmem:[%s4025_s0 + $0xb8] sm:$0x3f]  ;;  %v3075_v32 = vld [vmem:[%s4026_s3 + $0x8] sm:$0xf] }
   0xc   :  { %2631 = vmatprep.subr.msk.mxu0 %vm137_vm0, %v2201_v24  ;;  %v3066_v31 = vld [vmem:[%s4025_s0 + $0x11] sm:$0xff]  ;;  %v3082_v33 = vld [vmem:[%s4025_s0 + $0x19] sm:$0xff]  ;;  %v3089_v34 = vld [vmem:[%s4025_s0 + $0x21] sm:$0xff] }
   0xd   :  { %2488 = vmatmul.mubr.msk.f32.gmra.mxu0 %vm64_vm1, %v44_v13  ;;  %2506 = vmatmul.mubr.msk.f32.gmra.mxu1 %vm64_vm1, %v2968_v14  ;;  %v3103_v35 = vld [vmem:[%s4025_s0 + $0x29] sm:$0xff]  ;;  %v3108_v36 = vld [vmem:[%s4025_s0 + $0x31] sm:$0xff]  ;;  %v3119_v37 = vld [vmem:[%s4025_s0 + $0x39] sm:$0xff] }
   0xe   :  { %2490 = vmatprep.mubr.msk.f32.mxu0 %vm64_vm1, %v45_v16  ;;  %2508 = vmatprep.mubr.msk.f32.mxu1 %vm64_vm1, %v2979_v17  ;;  %v3124_v38 = vld [vmem:[%s4025_s0 + $0x41] sm:$0xff]  ;;  %v3135_v39 = vld [vmem:[%s4025_s0 + $0x49] sm:$0xff]  ;;  %v3140_v40 = vld [vmem:[%s4025_s0 + $0x51] sm:$0xff] }
   0xf   :  { %v3151_v41 = vld [vmem:[%s4025_s0 + $0x59] sm:$0xff]  ;;  %v3156_v42 = vld [vmem:[%s4025_s0 + $0x61] sm:$0xff]  ;;  %v3168_v43 = vld [vmem:[%s4025_s0 + $0x69] sm:$0xff] }
  0x10   :  { %v3173_v44 = vld [vmem:[%s4025_s0 + $0x71] sm:$0xff]  ;;  %v3186_v45 = vld [vmem:[%s4025_s0 + $0x79] sm:$0xff]  ;;  %v3191_v46 = vld [vmem:[%s4025_s0 + $0x81] sm:$0xff] }
  0x11   :  { %2491 = vmatmul.mubr.msk.f32.gmra.mxu0 %vm64_vm1, %v46_v18  ;;  %2509 = vmatmul.mubr.msk.f32.gmra.mxu1 %vm64_vm1, %v2996_v19  ;;  %v3204_v47 = vld [vmem:[%s4025_s0 + $0x89] sm:$0xff]  ;;  %v3209_v48 = vld [vmem:[%s4025_s0 + $0x91] sm:$0xff]  ;;  %v3222_v49 = vld [vmem:[%s4025_s0 + $0x99] sm:$0xff] }
  0x12   :  { %2493 = vmatprep.mubr.msk.f32.mxu0 %vm64_vm1, %v47_v20  ;;  %2511 = vmatprep.mubr.msk.f32.mxu1 %vm64_vm1, %v3004_v21  ;;  %v3227_v50 = vld [vmem:[%s4025_s0 + $0xa1] sm:$0xff]  ;;  %v3240_v51 = vld [vmem:[%s4025_s0 + $0xa9] sm:$0xff]  ;;  %v3245_v52 = vld [vmem:[%s4025_s0 + $0xb1] sm:$0xff] }
  0x13   :  { %v3258_v53 = vld [vmem:[%s4025_s0 + $0xb9] sm:$0x3f]  ;;  %v3263_v54 = vld [vmem:[%s4025_s0 + $0x2] sm:$0xff]  ;;  %v3276_v55 = vld [vmem:[%s4025_s0 + $0xa] sm:$0xff] }
  0x14   :  { %v3281_v56 = vld [vmem:[%s4025_s0 + $0x12] sm:$0xff]  ;;  %v3294_v57 = vld [vmem:[%s4025_s0 + $0x1a] sm:$0xff]  ;;  %v3301_v58 = vld [vmem:[%s4025_s0 + $0x22] sm:$0xff] }
  0x15   :  { %2494 = vmatmul.mubr.msk.f32.gmra.mxu0 %vm64_vm1, %v48_v22  ;;  %2512 = vmatmul.mubr.msk.f32.gmra.mxu1 %vm64_vm1, %v3018_v23  ;;  %v1092_v59 = vld [vmem:[%s4025_s0 + $0x2a] sm:$0xff]  ;;  %v1093_v60 = vld [vmem:[%s4025_s0 + $0x32] sm:$0xff]  ;;  %v1094_v61 = vld [vmem:[%s4025_s0 + $0x3a] sm:$0xff] }
  0x16   :  { %2496 = vmatprep.mubr.msk.f32.mxu0 %vm64_vm1, %v49_v25  ;;  %2514 = vmatprep.mubr.msk.f32.mxu1 %vm64_vm1, %v3029_v26  ;;  %v1095_v62 = vld [vmem:[%s4025_s0 + $0x42] sm:$0xff]  ;;  %v1096_v63 = vld [vmem:[%s4025_s0 + $0x4a] sm:$0xff]  ;;  %v1097_v0 = vld [vmem:[%s4025_s0 + $0x52] sm:$0xff] }
  0x17   :  { %v1102_v5 = vld [vmem:[%s4025_s0 + $0x7a] sm:$0xff]  ;;  %v1109_v12 = vld [vmem:[%s4025_s0 + $0xb2] sm:$0xff] }
  0x19   :  { %2497 = vmatmul.mubr.msk.f32.gmra.mxu0 %vm64_vm1, %v50_v27  ;;  %2515 = vmatmul.mubr.msk.f32.gmra.mxu1 %vm64_vm1, %v3044_v28 }
  0x1a   :  { %2519 = vmatprep.mubr.msk.f32.mxu1 %vm64_vm1, %v2892_v1  ;;  %2557 = vmatprep.mubr.msk.f32.mxu0 %vm64_vm1, %v3049_v29  ;;  %v1098_v1 = vld [vmem:[%s4025_s0 + $0x5a] sm:$0xff] }
  0x1d   :  { %2520 = vmatmul.mubr.msk.f32.vlgmr.msra.gmra.mxu1 %vm64_vm1, %v2904_v3  ;;  %2558 = vmatmul.mubr.msk.f32.vlgmr.msra.gmra.mxu0 %vm64_vm1, %v3061_v30  ;;  %v1100_v3 = vld [vmem:[%s4025_s0 + $0x6a] sm:$0xff] }
  0x1e   :  { %2594 = vmatpush3.msk.msra.mxu1 %vm137_vm0, %v2175_v15  ;;  %2522 = vmatprep.mubr.msk.f32.mxu1 %vm64_vm1, %v41_v6  ;;  %v1103_v6 = vld [vmem:[%s4025_s0 + $0x82] sm:$0xff] }
  0x1f   :  { %2560 = vmatprep.mubr.msk.f32.mxu0 %vm64_vm1, %v3066_v31  ;;  %2632 = vmatpush3.msk.msra.mxu0 %vm137_vm0, %v2201_v24 }
  0x20   :  { %2669 = vmatprep.subr.msk.mxu1 %vm137_vm0, %v3075_v32 }
  0x21   :  { %2523 = vmatmul.mubr.msk.f32.gmra.mxu1 %vm64_vm1, %v42_v8  ;;  %2561 = vmatmul.mubr.msk.f32.gmra.mxu0 %vm64_vm1, %v3082_v33  ;;  %v1105_v8 = vld [vmem:[%s4025_s0 + $0x92] sm:$0xff] }
  0x22   :  { %2525 = vmatprep.mubr.msk.f32.mxu1 %vm64_vm1, %v43_v10  ;;  %2563 = vmatprep.mubr.msk.f32.mxu0 %vm64_vm1, %v3089_v34  ;;  %v1107_v10 = vld [vmem:[%s4025_s0 + $0xa2] sm:$0xff] }
  0x25   :  { %2526 = vmatmul.mubr.msk.f32.gmra.mxu1 %vm64_vm1, %v44_v13  ;;  %2564 = vmatmul.mubr.msk.f32.gmra.mxu0 %vm64_vm1, %v3103_v35  ;;  %v1110_v13 = vld [vmem:[%s4025_s0 + $0xba] sm:$0x3f] }
  0x26   :  { %2528 = vmatprep.mubr.msk.f32.mxu1 %vm64_vm1, %v45_v16  ;;  %2566 = vmatprep.mubr.msk.f32.mxu0 %vm64_vm1, %v3108_v36 }
  0x29   :  { %2529 = vmatmul.mubr.msk.f32.gmra.mxu1 %vm64_vm1, %v46_v18  ;;  %2567 = vmatmul.mubr.msk.f32.gmra.mxu0 %vm64_vm1, %v3119_v37 }
  0x2a   :  { %2531 = vmatprep.mubr.msk.f32.mxu1 %vm64_vm1, %v47_v20  ;;  %2569 = vmatprep.mubr.msk.f32.mxu0 %vm64_vm1, %v3124_v38 }
  0x2d   :  { %2532 = vmatmul.mubr.msk.f32.gmra.mxu1 %vm64_vm1, %v48_v22  ;;  %2570 = vmatmul.mubr.msk.f32.gmra.mxu0 %vm64_vm1, %v3135_v39 }
  0x2e   :  { %2534 = vmatprep.mubr.msk.f32.mxu1 %vm64_vm1, %v49_v25  ;;  %2572 = vmatprep.mubr.msk.f32.mxu0 %vm64_vm1, %v3140_v40 }
  0x31   :  { %2535 = vmatmul.mubr.msk.f32.gmra.mxu1 %vm64_vm1, %v50_v27  ;;  %2573 = vmatmul.mubr.msk.f32.gmra.mxu0 %vm64_vm1, %v3151_v41 }
  0x32   :  { %2537 = vmatprep.mubr.msk.f32.mxu1 %vm64_vm1, %v2897_v2  ;;  %2575 = vmatprep.mubr.msk.f32.mxu0 %vm64_vm1, %v3156_v42  ;;  %v1099_v2 = vld [vmem:[%s4025_s0 + $0x62] sm:$0xff] }
  0x35   :  { %2538 = vmatmul.mubr.msk.f32.gmra.mxu1 %vm64_vm1, %v2909_v4  ;;  %2576 = vmatmul.mubr.msk.f32.gmra.mxu0 %vm64_vm1, %v3168_v43  ;;  %v1101_v4 = vld [vmem:[%s4025_s0 + $0x72] sm:$0xff] }
  0x36   :  { %2540 = vmatprep.mubr.msk.f32.mxu1 %vm64_vm1, %v2926_v7  ;;  %2578 = vmatprep.mubr.msk.f32.mxu0 %vm64_vm1, %v3173_v44  ;;  %v1104_v7 = vld [vmem:[%s4025_s0 + $0x8a] sm:$0xff] }
  0x39   :  { %2541 = vmatmul.mubr.msk.f32.gmra.mxu1 %vm64_vm1, %v2940_v9  ;;  %2579 = vmatmul.mubr.msk.f32.gmra.mxu0 %vm64_vm1, %v3186_v45  ;;  %v1106_v9 = vld [vmem:[%s4025_s0 + $0x9a] sm:$0xff] }
  0x3a   :  { %2543 = vmatprep.mubr.msk.f32.mxu1 %vm64_vm1, %v2951_v11  ;;  %2581 = vmatprep.mubr.msk.f32.mxu0 %vm64_vm1, %v3191_v46  ;;  %v1108_v11 = vld [vmem:[%s4025_s0 + $0xaa] sm:$0xff] }
  0x3d   :  { %2544 = vmatmul.mubr.msk.f32.gmra.mxu1 %vm64_vm1, %v2968_v14  ;;  %2582 = vmatmul.mubr.msk.f32.gmra.mxu0 %vm64_vm1, %v3204_v47  ;;  %v1806_v14 = vld [vmem:[%s4027_s5 + $0x18] sm:$0xff] }
  0x3e   :  { %2546 = vmatprep.mubr.msk.f32.mxu1 %vm64_vm1, %v2979_v17  ;;  %2584 = vmatprep.mubr.msk.f32.mxu0 %vm64_vm1, %v3209_v48 }
  0x3f   :  { %2707 = vmatprep.subr.mxu0 %v1806_v14 }
  0x41   :  { %2547 = vmatmul.mubr.msk.f32.gmra.mxu1 %vm64_vm1, %v2996_v19  ;;  %2585 = vmatmul.mubr.msk.f32.gmra.mxu0 %vm64_vm1, %v3222_v49 }
  0x42   :  { %2549 = vmatprep.mubr.msk.f32.mxu1 %vm64_vm1, %v3004_v21  ;;  %2587 = vmatprep.mubr.msk.f32.mxu0 %vm64_vm1, %v3227_v50 }
  0x45   :  { %2550 = vmatmul.mubr.msk.f32.gmra.mxu1 %vm64_vm1, %v3018_v23  ;;  %2588 = vmatmul.mubr.msk.f32.gmra.mxu0 %vm64_vm1, %v3240_v51 }
  0x46   :  { %2552 = vmatprep.mubr.msk.f32.mxu1 %vm64_vm1, %v3029_v26  ;;  %2590 = vmatprep.mubr.msk.f32.mxu0 %vm64_vm1, %v3245_v52 }
  0x49   :  { %2553 = vmatmul.mubr.msk.f32.gmra.mxu1 %vm64_vm1, %v3044_v28  ;;  %2591 = vmatmul.mubr.msk.f32.gmra.mxu0 %vm64_vm1, %v3258_v53 }
  0x4a   :  { %2595 = vmatprep.mubr.msk.f32.mxu1 %vm64_vm1, %v3049_v29  ;;  %2633 = vmatprep.mubr.msk.f32.mxu0 %vm64_vm1, %v3263_v54 }
  0x4d   :  { %2596 = vmatmul.mubr.msk.f32.vlgmr.msra.gmra.mxu1 %vm64_vm1, %v3061_v30  ;;  %2634 = vmatmul.mubr.msk.f32.vlgmr.msra.gmra.mxu0 %vm64_vm1, %v3276_v55 }
  0x4e   :  { %2670 = vmatpush3.msk.msra.mxu1 %vm137_vm0, %v3075_v32  ;;  %2598 = vmatprep.mubr.msk.f32.mxu1 %vm64_vm1, %v3066_v31 }
  0x4f   :  { %2636 = vmatprep.mubr.msk.f32.mxu0 %vm64_vm1, %v3281_v56  ;;  %2708 = vmatpush3.msra.mxu0 %v1806_v14 }
  0x51   :  { %2599 = vmatmul.mubr.msk.f32.gmra.mxu1 %vm64_vm1, %v3082_v33  ;;  %2637 = vmatmul.mubr.msk.f32.gmra.mxu0 %vm64_vm1, %v3294_v57 }
  0x52   :  { %2601 = vmatprep.mubr.msk.f32.mxu1 %vm64_vm1, %v3089_v34  ;;  %2639 = vmatprep.mubr.msk.f32.mxu0 %vm64_vm1, %v3301_v58 }
  0x55   :  { %2602 = vmatmul.mubr.msk.f32.gmra.mxu1 %vm64_vm1, %v3103_v35  ;;  %2640 = vmatmul.mubr.msk.f32.gmra.mxu0 %vm64_vm1, %v1092_v59  ;;  %v1805_v35 = vld [vmem:[%s4027_s5 + $0x10] sm:$0xff] }
  0x56   :  { %2604 = vmatprep.mubr.msk.f32.mxu1 %vm64_vm1, %v3108_v36  ;;  %2642 = vmatprep.mubr.msk.f32.mxu0 %vm64_vm1, %v1093_v60 }
  0x57   :  { %2709 = vmatprep.subr.mxu0 %v1805_v35 }
  0x58   :  { %2710 = vmatpush3.msra.mxu0 %v1805_v35 }
  0x59   :  { %2605 = vmatmul.mubr.msk.f32.gmra.mxu1 %vm64_vm1, %v3119_v37  ;;  %2643 = vmatmul.mubr.msk.f32.gmra.mxu0 %vm64_vm1, %v1094_v61 }
  0x5a   :  { %2607 = vmatprep.mubr.msk.f32.mxu1 %vm64_vm1, %v3124_v38  ;;  %2645 = vmatprep.mubr.msk.f32.mxu0 %vm64_vm1, %v1095_v62 }
  0x5d   :  { %2608 = vmatmul.mubr.msk.f32.gmra.mxu1 %vm64_vm1, %v3135_v39  ;;  %2646 = vmatmul.mubr.msk.f32.gmra.mxu0 %vm64_vm1, %v1096_v63 }
  0x5e   :  { %2610 = vmatprep.mubr.msk.f32.mxu1 %vm64_vm1, %v3140_v40  ;;  %2648 = vmatprep.mubr.msk.f32.mxu0 %vm64_vm1, %v1097_v0 }
  0x61   :  { %2611 = vmatmul.mubr.msk.f32.gmra.mxu1 %vm64_vm1, %v3151_v41  ;;  %2649 = vmatmul.mubr.msk.f32.gmra.mxu0 %vm64_vm1, %v1098_v1 }
  0x62   :  { %2613 = vmatprep.mubr.msk.f32.mxu1 %vm64_vm1, %v3156_v42  ;;  %2651 = vmatprep.mubr.msk.f32.mxu0 %vm64_vm1, %v1099_v2 }
  0x65   :  { %2614 = vmatmul.mubr.msk.f32.gmra.mxu1 %vm64_vm1, %v3168_v43  ;;  %2652 = vmatmul.mubr.msk.f32.gmra.mxu0 %vm64_vm1, %v1100_v3 }
  0x66   :  { %2616 = vmatprep.mubr.msk.f32.mxu1 %vm64_vm1, %v3173_v44  ;;  %2654 = vmatprep.mubr.msk.f32.mxu0 %vm64_vm1, %v1101_v4 }
  0x69   :  { %2617 = vmatmul.mubr.msk.f32.gmra.mxu1 %vm64_vm1, %v3186_v45  ;;  %2655 = vmatmul.mubr.msk.f32.gmra.mxu0 %vm64_vm1, %v1102_v5 }
  0x6a   :  { %2619 = vmatprep.mubr.msk.f32.mxu1 %vm64_vm1, %v3191_v46  ;;  %2657 = vmatprep.mubr.msk.f32.mxu0 %vm64_vm1, %v1103_v6 }
  0x6d   :  { %2620 = vmatmul.mubr.msk.f32.gmra.mxu1 %vm64_vm1, %v3204_v47  ;;  %2658 = vmatmul.mubr.msk.f32.gmra.mxu0 %vm64_vm1, %v1104_v7 }
  0x6e   :  { %2622 = vmatprep.mubr.msk.f32.mxu1 %vm64_vm1, %v3209_v48  ;;  %2660 = vmatprep.mubr.msk.f32.mxu0 %vm64_vm1, %v1105_v8  ;;  %v1804_v48 = vld [vmem:[%s4027_s5 + $0x8] sm:$0xff] }
  0x6f   :  { %2711 = vmatprep.subr.mxu0 %v1804_v48 }
  0x70   :  { %2712 = vmatpush3.msra.mxu0 %v1804_v48 }
  0x71   :  { %2623 = vmatmul.mubr.msk.f32.gmra.mxu1 %vm64_vm1, %v3222_v49  ;;  %2661 = vmatmul.mubr.msk.f32.gmra.mxu0 %vm64_vm1, %v1106_v9 }
  0x72   :  { %2625 = vmatprep.mubr.msk.f32.mxu1 %vm64_vm1, %v3227_v50  ;;  %2663 = vmatprep.mubr.msk.f32.mxu0 %vm64_vm1, %v1107_v10 }
  0x75   :  { %2626 = vmatmul.mubr.msk.f32.gmra.mxu1 %vm64_vm1, %v3240_v51  ;;  %2664 = vmatmul.mubr.msk.f32.gmra.mxu0 %vm64_vm1, %v1108_v11  ;;  %v1803_v51 = vld [vmem:[%s4027_s5] sm:$0xff] }
  0x76   :  { %2628 = vmatprep.mubr.msk.f32.mxu1 %vm64_vm1, %v3245_v52  ;;  %2666 = vmatprep.mubr.msk.f32.mxu0 %vm64_vm1, %v1109_v12 }
  0x77   :  { %2713 = vmatprep.subr.mxu0 %v1803_v51 }
  0x78   :  { %2714 = vmatpush3.msra.mxu0 %v1803_v51 }
  0x79   :  { %2629 = vmatmul.mubr.msk.f32.gmra.mxu1 %vm64_vm1, %v3258_v53  ;;  %2667 = vmatmul.mubr.msk.f32.gmra.mxu0 %vm64_vm1, %v1110_v13 }
  0x7a   :  { %2671 = vmatprep.mubr.msk.f32.mxu1 %vm64_vm1, %v3263_v54 }
  0x7d   :  { %2672 = vmatmul.mubr.msk.f32.vlgmr.msra.gmra.mxu1 %vm64_vm1, %v3276_v55 }
  0x7e   :  { %2674 = vmatprep.mubr.msk.f32.mxu1 %vm64_vm1, %v3281_v56 }
  0x81   :  { %2675 = vmatmul.mubr.msk.f32.gmra.mxu1 %vm64_vm1, %v3294_v57 }
  0x82   :  { %2677 = vmatprep.mubr.msk.f32.mxu1 %vm64_vm1, %v3301_v58 }
  0x85   :  { %2678 = vmatmul.mubr.msk.f32.gmra.mxu1 %vm64_vm1, %v1092_v59 }
  0x86   :  { %2680 = vmatprep.mubr.msk.f32.mxu1 %vm64_vm1, %v1093_v60 }
  0x89   :  { %2681 = vmatmul.mubr.msk.f32.gmra.mxu1 %vm64_vm1, %v1094_v61 }
  0x8a   :  { %2683 = vmatprep.mubr.msk.f32.mxu1 %vm64_vm1, %v1095_v62 }
  0x8d   :  { %2684 = vmatmul.mubr.msk.f32.gmra.mxu1 %vm64_vm1, %v1096_v63 }
  0x8e   :  { %2686 = vmatprep.mubr.msk.f32.mxu1 %vm64_vm1, %v1097_v0 }
  0x91   :  { %2687 = vmatmul.mubr.msk.f32.gmra.mxu1 %vm64_vm1, %v1098_v1 }
  0x92   :  { %2689 = vmatprep.mubr.msk.f32.mxu1 %vm64_vm1, %v1099_v2 }
  0x95   :  { %2690 = vmatmul.mubr.msk.f32.gmra.mxu1 %vm64_vm1, %v1100_v3 }
  0x96   :  { %2692 = vmatprep.mubr.msk.f32.mxu1 %vm64_vm1, %v1101_v4 }
  0x99   :  { %2693 = vmatmul.mubr.msk.f32.gmra.mxu1 %vm64_vm1, %v1102_v5 }
  0x9a   :  { %2695 = vmatprep.mubr.msk.f32.mxu1 %vm64_vm1, %v1103_v6 }
  0x9d   :  { %2696 = vmatmul.mubr.msk.f32.gmra.mxu1 %vm64_vm1, %v1104_v7 }
  0x9e   :  { %2698 = vmatprep.mubr.msk.f32.mxu1 %vm64_vm1, %v1105_v8 }
  0xa1   :  { %2699 = vmatmul.mubr.msk.f32.gmra.mxu1 %vm64_vm1, %v1106_v9 }
  0xa2   :  { %2701 = vmatprep.mubr.msk.f32.mxu1 %vm64_vm1, %v1107_v10 }
  0xa5   :  { %2702 = vmatmul.mubr.msk.f32.gmra.mxu1 %vm64_vm1, %v1108_v11 }
  0xa6   :  { %2704 = vmatprep.mubr.msk.f32.mxu1 %vm64_vm1, %v1109_v12 }
  0xa9   :  { %2705 = vmatmul.mubr.msk.f32.gmra.mxu1 %vm64_vm1, %v1110_v13 }
  0xc5   :  { %v3457_v15 = vpop.f32.mrf.mxu0  ;;  %v3459_v16 = vpop.f32.mrf.mxu1 }
  0xc6   :  { %4031 = vst [vmem:[#allocation2_spill] sm:$0xff] %v3459_v16 }
  0xc7   :  { %v3461_v17 = vpop.f32.mrf.mxu0  ;;  %v3463_v18 = vpop.f32.mrf.mxu1 }
  0xc8   :  { %4032 = vst [vmem:[#allocation3_spill] sm:$0xff] %v3463_v18 }
  0xc9   :  { %v3465_v19 = vpop.f32.mrf.mxu0  ;;  %v3467_v20 = vpop.f32.mrf.mxu1 }
  0xca   :  { %4033 = vst [vmem:[#allocation4_spill] sm:$0xff] %v3467_v20 }
  0xcb   :  { %v3469_v21 = vpop.f32.mrf.mxu0  ;;  %v3471_v22 = vpop.f32.mrf.mxu1 }
  0xcc   :  { %4034 = vst [vmem:[#allocation5_spill] sm:$0xff] %v3471_v22 }
  0xcd   :  { %v3473_v23 = vpop.f32.mrf.mxu0  ;;  %v3475_v24 = vpop.f32.mrf.mxu1 }
  0xce   :  { %4035 = vst [vmem:[#allocation6_spill] sm:$0xff] %v3475_v24 }
  0xcf   :  { %v3477_v25 = vpop.f32.mrf.mxu0  ;;  %v3479_v26 = vpop.f32.mrf.mxu1 }
  0xd0   :  { %4036 = vst [vmem:[#allocation7_spill] sm:$0xff] %v3479_v26 }
  0xd1   :  { %v3481_v27 = vpop.f32.mrf.mxu0  ;;  %v3483_v28 = vpop.f32.mrf.mxu1 }
  0xd2   :  { %4037 = vst [vmem:[#allocation8_spill] sm:$0xff] %v3483_v28 }
  0xd3   :  { %v3485_v29 = vpop.f32.mrf.mxu0  ;;  %v3487_v30 = vpop.f32.mrf.mxu1 }
  0xd4   :  { %4038 = vst [vmem:[#allocation9_spill] sm:$0xff] %v3487_v30 }
  0xd5   :  { %v3489_v31 = vpop.f32.mrf.mxu0  ;;  %v3491_v32 = vpop.f32.mrf.mxu1 }
  0xd6   :  { %4039 = vst [vmem:[#allocation10_spill] sm:$0xff] %v3491_v32 }
  0xd7   :  { %v3493_v33 = vpop.f32.mrf.mxu0  ;;  %v3495_v34 = vpop.f32.mrf.mxu1 }
  0xd8   :  { %4040 = vst [vmem:[#allocation11_spill] sm:$0xff] %v3495_v34 }
  0xd9   :  { %v3500_v36 = vpop.f32.mrf.mxu0  ;;  %v3502_v37 = vpop.f32.mrf.mxu1 }
  0xda   :  { %4041 = vst [vmem:[#allocation12_spill] sm:$0xff] %v3502_v37 }
  0xdb   :  { %v3504_v38 = vpop.f32.mrf.mxu0  ;;  %v3506_v39 = vpop.f32.mrf.mxu1 }
  0xdc   :  { %4042 = vst [vmem:[#allocation13_spill] sm:$0xff] %v3506_v39 }
  0xdd   :  { %v3508_v40 = vpop.f32.mrf.mxu1  ;;  %v3510_v41 = vpop.f32.mrf.mxu0 }
  0xdf   :  { %v3512_v42 = vpop.f32.mrf.mxu1  ;;  %v3514_v43 = vpop.f32.mrf.mxu0 }
  0xe1   :  { %v3516_v44 = vpop.f32.mrf.mxu1  ;;  %v3518_v45 = vpop.f32.mrf.mxu0 }
  0xe3   :  { %v3520_v46 = vpop.f32.mrf.mxu1  ;;  %v3522_v47 = vpop.f32.mrf.mxu0 }
  0xe5   :  { %v3527_v49 = vpop.f32.mrf.mxu1  ;;  %v3529_v50 = vpop.f32.mrf.mxu0 }
  0xe7   :  { %v3534_v52 = vpop.f32.mrf.mxu1  ;;  %v3536_v53 = vpop.f32.mrf.mxu0 }
  0xe9   :  { %v3538_v54 = vpop.f32.mrf.mxu1  ;;  %v3540_v55 = vpop.f32.mrf.mxu0 }
  0xeb   :  { %v3542_v56 = vpop.f32.mrf.mxu1  ;;  %v3544_v57 = vpop.f32.mrf.mxu0 }
  0xed   :  { %v3546_v58 = vpop.f32.mrf.mxu1  ;;  %v3548_v59 = vpop.f32.mrf.mxu0 }
  0xef   :  { %v3550_v60 = vpop.f32.mrf.mxu1  ;;  %v3552_v61 = vpop.f32.mrf.mxu0 }
  0xf1   :  { %v3554_v62 = vpop.f32.mrf.mxu1  ;;  %v3558_v0 = vpop.f32.mrf.mxu0 }
  0xf2   :  { %4043 = vst [vmem:[#allocation14_spill] sm:$0xff] %v3558_v0 }
  0xf3   :  { %v3556_v63 = vpop.f32.mrf.mxu1  ;;  %v3564_v3 = vpop.f32.mrf.mxu0 }
  0xf4   :  { %4044 = vst [vmem:[#allocation15_spill] sm:$0xff] %v3564_v3 }
  0xf5   :  { %v3560_v1 = vpop.f32.mrf.mxu1  ;;  %v3570_v6 = vpop.f32.mrf.mxu0 }
  0xf6   :  { %4045 = vst [vmem:[#allocation16_spill] sm:$0xff] %v3570_v6 }
  0xf7   :  { %v3562_v2 = vpop.f32.mrf.mxu1  ;;  %v3576_v9 = vpop.f32.mrf.mxu0 }
  0xf8   :  { %4047 = vst [vmem:[#allocation18_spill] sm:$0xff] %v3576_v9 }
  0xf9   :  { %v3566_v4 = vpop.f32.mrf.mxu1  ;;  %v3582_v12 = vpop.f32.mrf.mxu0 }
  0xfa   :  { %4050 = vst [vmem:[#allocation21_spill] sm:$0xff] %v3582_v12 }
  0xfb   :  { %v3568_v5 = vpop.f32.mrf.mxu1  ;;  %v3588_v35 = vpop.f32.mrf.mxu0 }
  0xfc   :  { %4053 = vst [vmem:[#allocation24_spill] sm:$0xff] %v3588_v35 }
  0xfd   :  { %v3572_v7 = vpop.f32.mrf.mxu1  ;;  %v3594_v39 = vpop.f32.mrf.mxu0 }
  0xfe   :  { %4056 = vst [vmem:[#allocation27_spill] sm:$0xff] %v3594_v39 }
  0xff   :  { %v3574_v8 = vpop.f32.mrf.mxu1  ;;  %v3596_v32 = vpop.f32.mrf.mxu0 }
 0x100   :  { %4046 = vst [vmem:[#allocation17_spill] sm:$0xff] %v3574_v8  ;;  %4057 = vst [vmem:[#allocation28_spill] sm:$0xff] %v3596_v32 }
 0x101   :  { %v3578_v10 = vpop.f32.mrf.mxu1  ;;  %v3598_v26 = vpop.f32.mrf.mxu0 }
 0x102   :  { %4048 = vst [vmem:[#allocation19_spill] sm:$0xff] %v3578_v10  ;;  %4058 = vst [vmem:[#allocation29_spill] sm:$0xff] %v3598_v26 }
 0x103   :  { %v3580_v11 = vpop.f32.mrf.mxu1  ;;  %v3602_v22 = vpop.f32.mrf.mxu0 }
 0x104   :  { %4049 = vst [vmem:[#allocation20_spill] sm:$0xff] %v3580_v11  ;;  %4059 = vst [vmem:[#allocation30_spill] sm:$0xff] %v3602_v22 }
 0x105   :  { %v3584_v13 = vpop.f32.mrf.mxu1  ;;  %v3608_v20 = vpop.f32.mrf.mxu0 }
 0x106   :  { %4051 = vst [vmem:[#allocation22_spill] sm:$0xff] %v3584_v13  ;;  %4060 = vst [vmem:[#allocation31_spill] sm:$0xff] %v3608_v20 }
 0x107   :  { %v3586_v14 = vpop.f32.mrf.mxu1  ;;  %v3614_v32 = vpop.f32.mrf.mxu0 }
 0x108   :  { %4052 = vst [vmem:[#allocation23_spill] sm:$0xff] %v3586_v14  ;;  %4061 = vst [vmem:[#allocation32_spill] sm:$0xff] %v3614_v32 }
 0x109   :  { %v3590_v48 = vpop.f32.mrf.mxu1  ;;  %v3620_v16 = vpop.f32.mrf.mxu0 }
 0x10a   :  { %4054 = vst [vmem:[#allocation25_spill] sm:$0xff] %v3590_v48  ;;  %4062 = vst [vmem:[#allocation33_spill] sm:$0xff] %v3620_v16 }
 0x10b   :  { %v3592_v51 = vpop.f32.mrf.mxu1  ;;  %v3626_v0 = vpop.f32.mrf.mxu0 }
 0x10c   :  { %4055 = vst [vmem:[#allocation26_spill] sm:$0xff] %v3592_v51  ;;  %4065 = vst [vmem:[#allocation36_spill] sm:$0xff] %v3626_v0  ;;  %v3651_v0 = vld [vmem:[%s4028_s4] ss:$0 sm:$0xff] }
 0x10d   :  { %v2597_v37 = vpop.f32.mrf.mxu1  ;;  %v3632_v48 = vpop.f32.mrf.mxu0 }
 0x10e   :  { %4068 = vst [vmem:[#allocation39_spill] sm:$0xff] %v3632_v48 }
 0x10f   :  { %v944_v34 = vpop.f32.mrf.mxu1  ;;  %v3638_v13 = vpop.f32.mrf.mxu0 }
 0x110   :  { %4071 = vst [vmem:[#allocation42_spill] sm:$0xff] %v3638_v13 }
 0x111   :  { %v2600_v30 = vpop.f32.mrf.mxu1  ;;  %v3644_v10 = vpop.f32.mrf.mxu0 }
 0x112   :  { %4074 = vst [vmem:[#allocation45_spill] sm:$0xff] %v3644_v10 }
 0x113   :  { %v954_v28 = vpop.f32.mrf.mxu1 }
 0x115   :  { %v2603_v24 = vpop.f32.mrf.mxu1 }
 0x117   :  { %v3600_v12 = vpop.f32.mrf.mxu1 }
 0x119   :  { %v3604_v35 = vpop.f32.mrf.mxu1 }
 0x11b   :  { %v3606_v9 = vpop.f32.mrf.mxu1 }
 0x11d   :  { %v3610_v39 = vpop.f32.mrf.mxu1 }
 0x11f   :  { %v3612_v6 = vpop.f32.mrf.mxu1 }
 0x121   :  { %v3616_v18 = vpop.f32.mrf.mxu1 }
 0x123   :  { %v3618_v26 = vpop.f32.mrf.mxu1 }
 0x125   :  { %v3622_v3 = vpop.f32.mrf.mxu1 }
 0x126   :  { %4063 = vst [vmem:[#allocation34_spill] sm:$0xff] %v3622_v3 }
 0x127   :  { %v3624_v22 = vpop.f32.mrf.mxu1 }
 0x128   :  { %4064 = vst [vmem:[#allocation35_spill] sm:$0xff] %v3624_v22 }
 0x129   :  { %v3628_v51 = vpop.f32.mrf.mxu1 }
 0x12a   :  { %4066 = vst [vmem:[#allocation37_spill] sm:$0xff] %v3628_v51  ;;  %v542_v51 = vadd.f32 %v3516_v44, %v3651_v0 }
 0x12b   :  { %v3630_v20 = vpop.f32.mrf.mxu1 }
 0x12c   :  { %4067 = vst [vmem:[#allocation38_spill] sm:$0xff] %v3630_v20 }
 0x12d   :  { %v3634_v14 = vpop.f32.mrf.mxu1 }
 0x12e   :  { %4069 = vst [vmem:[#allocation40_spill] sm:$0xff] %v3634_v14  ;;  %v3655_v14 = vpop.f32.mrf.mxu0 }
 0x12f   :  { %v3636_v32 = vpop.f32.mrf.mxu1  ;;  %4077 = vst [vmem:[#allocation48_spill] sm:$0xff] %v3655_v14 }
 0x130   :  { %4070 = vst [vmem:[#allocation41_spill] sm:$0xff] %v3636_v32  ;;  %v3665_v10 = vpop.f32.mrf.mxu0 }
 0x131   :  { %v3640_v11 = vpop.f32.mrf.mxu1  ;;  %4080 = vst [vmem:[#allocation51_spill] sm:$0xff] %v3665_v10 }
 0x132   :  { %4072 = vst [vmem:[#allocation43_spill] sm:$0xff] %v3640_v11  ;;  %v540_v11 = vadd.f32 %v3508_v40, %v3651_v0  ;;  %v541_v40 = vadd.f32 %v3651_v0, %v3520_v46 }
 0x133   :  { %v3642_v16 = vpop.f32.mrf.mxu1 }
 0x134   :  { %4073 = vst [vmem:[#allocation44_spill] sm:$0xff] %v3642_v16  ;;  %v539_v16 = vadd.f32 %v3651_v0, %v3512_v42 }
 0x135   :  { %v3646_v22 = vpop.f32.mrf.mxu1 }
 0x136   :  { %4075 = vst [vmem:[#allocation46_spill] sm:$0xff] %v3646_v22  ;;  %v1064_v22 = vadd.f32 %v2597_v37, %v540_v11 }
 0x137   :  { %v3653_v48 = vpop.f32.mrf.mxu1 }
 0x138   :  { %4076 = vst [vmem:[#allocation47_spill] sm:$0xff] %v3653_v48  ;;  %v1063_v48 = vadd.f32 %v944_v34, %v539_v16  ;;  %v544_v16 = vadd.f32 %v3527_v49, %v3651_v0  ;;  %v1065_v34 = vadd.f32 %v954_v28, %v541_v40 }
 0x139   :  { %v3657_v32 = vpop.f32.mrf.mxu1 }
 0x13a   :  { %4078 = vst [vmem:[#allocation49_spill] sm:$0xff] %v3657_v32  ;;  %v3672_v32 = vld [vmem:[%s4029_s2] ss:$0 sm:$0xff] }
 0x13b   :  { %v3661_v13 = vpop.f32.mrf.mxu1  ;;  %v327_v11 = vadd.f32 %v3457_v15, %v3672_v32  ;;  %v326_v44 = vadd.f32 %v3672_v32, %v3461_v17  ;;  %v328_v46 = vadd.f32 %v3672_v32, %v3469_v21  ;;  %v331_v15 = vadd.f32 %v3473_v23, %v3672_v32 }
 0x13c   :  { %4079 = vst [vmem:[#allocation50_spill] sm:$0xff] %v3661_v13  ;;  %v1066_v13 = vadd.f32 %v2600_v30, %v542_v51  ;;  %v329_v30 = vadd.f32 %v3465_v19, %v3672_v32  ;;  %v543_v17 = vadd.f32 %v3651_v0, %v3534_v52  ;;  %v333_v19 = vadd.f32 %v3481_v27, %v3672_v32 }
 0x13d   :  { %v2673_v20 = vpop.f32.mrf.mxu1  ;;  %v332_v21 = vadd.f32 %v3672_v32, %v3485_v29  ;;  %v546_v23 = vadd.f32 %v3538_v54, %v3651_v0  ;;  %v334_v27 = vadd.f32 %v3672_v32, %v3493_v33  ;;  %v3709_v29 = vadd.f32 %v3500_v36, %v3672_v32 }
 0x13e   :  { %v1588_v8 = vadd.f32 %v2673_v20, %v1064_v22  ;;  %v3682_v20 = vpop.f32.mrf.mxu0  ;;  %v545_v54 = vadd.f32 %v3651_v0, %v3542_v56  ;;  %v3722_v33 = vadd.f32 %v3514_v43, %v326_v44  ;;  %v548_v36 = vadd.f32 %v3546_v58, %v3651_v0 }
 0x13f   :  { %v1468_v14 = vpop.f32.mrf.mxu1  ;;  %v1070_v40 = vadd.f32 %v3604_v35, %v546_v23  ;;  %v3736_v43 = vadd.f32 %v3529_v50, %v331_v15  ;;  %v547_v58 = vadd.f32 %v3651_v0, %v3550_v60  ;;  %v550_v50 = vadd.f32 %v3554_v62, %v3651_v0 }
 0x140   :  { %v2254_v42 = vmul.f32 -1.442695, %v1588_v8  ;;  %v1587_v37 = vadd.f32 %v1468_v14, %v1063_v48  ;;  %v1068_v8 = vadd.f32 %v2603_v24, %v544_v16  ;;  %v3700_v48 = vpop.f32.mrf.mxu0  ;;  %v1067_v24 = vadd.f32 %v3600_v12, %v543_v17 }
 0x141   :  { %v2676_v22 = vpop.f32.mrf.mxu1  ;;  %v1069_v35 = vadd.f32 %v3606_v9, %v545_v54  ;;  %v1072_v44 = vadd.f32 %v3610_v39, %v548_v36  ;;  %v1071_v39 = vadd.f32 %v3612_v6, %v547_v58  ;;  %v1074_v62 = vadd.f32 %v3616_v18, %v550_v50  ;;  %v4083_v36 = vld [vmem:[#allocation19_spill] sm:$0xff]  ;;  %v4086_v50 = vld [vmem:[#allocation22_spill] sm:$0xff] }
 0x142   :  { %2754 = vpow2.f32 %v2254_v42  ;;  %v2253_v10 = vmul.f32 -1.442695, %v1587_v37  ;;  %v1590_v3 = vadd.f32 %v2676_v22, %v1066_v13  ;;  %v330_v13 = vadd.f32 %v3672_v32, %v3477_v25  ;;  %v3726_v56 = vpop.f32.mrf.mxu0 }
 0x143   :  { %v1478_v49 = vpop.f32.mrf.mxu1  ;;  %v335_v25 = vadd.f32 %v3489_v31, %v3672_v32  ;;  %v3716_v37 = vadd.f32 %v3672_v32, %v3504_v38  ;;  %v3719_v31 = vadd.f32 %v3510_v41, %v327_v11  ;;  %v3730_v38 = vadd.f32 %v3518_v45, %v329_v30 }
 0x144   :  { %2756 = vpow2.f32 %v2253_v10  ;;  %v2256_v14 = vmul.f32 -1.442695, %v1590_v3  ;;  %v1589_v28 = vadd.f32 %v1478_v49, %v1065_v34  ;;  %v3733_v41 = vadd.f32 %v3522_v47, %v328_v46  ;;  %v3752_v30 = vpop.f32.mrf.mxu0 }
 0x145   :  { %v2679_v52 = vpop.f32.mrf.mxu1  ;;  %v3742_v49 = vadd.f32 %v3536_v53, %v330_v13  ;;  %v3745_v45 = vadd.f32 %v3540_v55, %v333_v19  ;;  %v3748_v47 = vadd.f32 %v3544_v57, %v332_v21  ;;  %v3756_v53 = vadd.f32 %v3548_v59, %v335_v25 }
 0x146   :  { %2758 = vpow2.f32 %v2256_v14  ;;  %v2255_v3 = vmul.f32 -1.442695, %v1589_v28  ;;  %v1592_v10 = vadd.f32 %v2679_v52, %v1068_v8  ;;  %v3759_v55 = vadd.f32 %v3552_v61, %v334_v27  ;;  %v3770_v23 = vpop.f32.mrf.mxu0 }
 0x147   :  { %v1488_v51 = vpop.f32.mrf.mxu1  ;;  %v549_v57 = vadd.f32 %v3651_v0, %v3556_v63  ;;  %v552_v21 = vadd.f32 %v3560_v1, %v3651_v0  ;;  %v551_v59 = vadd.f32 %v3651_v0, %v3562_v2  ;;  %v554_v61 = vadd.f32 %v3566_v4, %v3651_v0  ;;  %v4081_v2 = vld [vmem:[#allocation34_spill] sm:$0xff] }
 0x148   :  { %2760 = vpow2.f32 %v2255_v3  ;;  %v2258_v12 = vmul.f32 -1.442695, %v1592_v10  ;;  %v1591_v42 = vadd.f32 %v1488_v51, %v1067_v24  ;;  %v553_v25 = vadd.f32 %v3651_v0, %v3568_v5  ;;  %v4084_v5 = vld [vmem:[#allocation35_spill] sm:$0xff] }
 0x149   :  { %v2682_v16 = vpop.f32.mrf.mxu1  ;;  %v1073_v63 = vadd.f32 %v3618_v26, %v549_v57  ;;  %v556_v1 = vadd.f32 %v3572_v7, %v3651_v0  ;;  %v1076_v27 = vadd.f32 %v4081_v2, %v552_v21 }
 0x14a   :  { %2762 = vpow2.f32 %v2258_v12  ;;  %v2257_v22 = vmul.f32 -1.442695, %v1591_v42  ;;  %v1594_v34 = vadd.f32 %v2682_v16, %v1070_v40  ;;  %v4082_v12 = vld [vmem:[#allocation17_spill] sm:$0xff]  ;;  %v558_v16 = vadd.f32 %v4083_v36, %v3651_v0 }
 0x14b   :  { %v1498_v11 = vpop.f32.mrf.mxu1  ;;  %v555_v42 = vadd.f32 %v3651_v0, %v4082_v12 }
 0x14c   :  { %2764 = vpow2.f32 %v2257_v22  ;;  %v2260_v9 = vmul.f32 -1.442695, %v1594_v34  ;;  %v1593_v17 = vadd.f32 %v1498_v11, %v1069_v35  ;;  %v3782_v35 = vpop.f32.mrf.mxu0  ;;  %v1075_v22 = vadd.f32 %v4084_v5, %v551_v59  ;;  %v4090_v59 = vld [vmem:[#allocation38_spill] sm:$0xff] }
 0x14d   :  { %v2685_v60 = vpop.f32.mrf.mxu1  ;;  %v4094_v5 = vld [vmem:[#allocation42_spill] sm:$0xff] }
 0x14e   :  { %2766 = vpow2.f32 %v2260_v9  ;;  %v2259_v46 = vmul.f32 -1.442695, %v1593_v17  ;;  %v1596_v15 = vadd.f32 %v2685_v60, %v1072_v44  ;;  %v4085_v9 = vld [vmem:[#allocation20_spill] sm:$0xff]  ;;  %v3789_v60 = vadd.f32 %v4086_v50, %v3651_v0  ;;  %v3798_v21 = vpop.f32.mrf.mxu0 }
 0x14f   :  { %v2755_v8 = vpop.eup %2754  ;;  %v1508_v14 = vpop.f32.mrf.mxu1  ;;  %v557_v17 = vadd.f32 %v3651_v0, %v4085_v9 }
 0x150   :  { %v1684_v28 = vadd.f32 1.0, %v2755_v8  ;;  %2768 = vpow2.f32 %v2259_v46  ;;  %v2262_v13 = vmul.f32 -1.442695, %v1596_v15  ;;  %v1595_v6 = vadd.f32 %v1508_v14, %v1071_v39  ;;  %v4087_v39 = vld [vmem:[#allocation37_spill] sm:$0xff] }
 0x151   :  { %v2757_v19 = vpop.eup %2756  ;;  %v2688_v18 = vpop.f32.mrf.mxu1  ;;  %v1078_v46 = vadd.f32 %v4087_v39, %v554_v61  ;;  %v4097_v39 = vld [vmem:[#allocation48_spill] sm:$0xff] }
 0x152   :  { %2770 = vrcp.f32 %v1684_v28  ;;  %v1683_v52 = vadd.f32 1.0, %v2757_v19  ;;  %v2261_v24 = vmul.f32 -1.442695, %v1595_v6  ;;  %v1598_v3 = vadd.f32 %v2688_v18, %v1074_v62  ;;  %v4088_v28 = vld [vmem:[#allocation23_spill] sm:$0xff]  ;;  %v4089_v6 = vld [vmem:[#allocation25_spill] sm:$0xff] }
 0x153   :  { %v2759_v10 = vpop.eup %2758  ;;  %2772 = vpow2.f32 %v2262_v13  ;;  %v1518_v4 = vpop.f32.mrf.mxu1  ;;  %v559_v13 = vadd.f32 %v3651_v0, %v4088_v28  ;;  %v3796_v19 = vadd.f32 %v4089_v6, %v3651_v0 }
 0x154   :  { %2774 = vrcp.f32 %v1683_v52  ;;  %v1686_v54 = vadd.f32 1.0, %v2759_v10  ;;  %v2264_v51 = vmul.f32 -1.442695, %v1598_v3  ;;  %v1597_v26 = vadd.f32 %v1518_v4, %v1073_v63  ;;  %v4091_v10 = vld [vmem:[#allocation26_spill] sm:$0xff] }
 0x155   :  { %v2761_v40 = vpop.eup %2760  ;;  %2776 = vpow2.f32 %v2261_v24  ;;  %v2691_v7 = vpop.f32.mrf.mxu1  ;;  %v1077_v63 = vadd.f32 %v4090_v59, %v553_v25  ;;  %v3803_v2 = vadd.f32 %v3651_v0, %v4091_v10  ;;  %v1377_v59 = vadd.f32 %v3682_v20, %v3742_v49 }
 0x156   :  { %2778 = vrcp.f32 %v1686_v54  ;;  %v1685_v34 = vadd.f32 1.0, %v2761_v40  ;;  %v2263_v58 = vmul.f32 -1.442695, %v1597_v26  ;;  %v1600_v11 = vadd.f32 %v2691_v7, %v1076_v27  ;;  %v4092_v27 = vld [vmem:[#allocation39_spill] sm:$0xff]  ;;  %v4093_v54 = vld [vmem:[#allocation40_spill] sm:$0xff]  ;;  %v4095_v7 = vld [vmem:[#allocation45_spill] sm:$0xff] }
 0x157   :  { %v2763_v44 = vpop.eup %2762  ;;  %2780 = vpow2.f32 %v2264_v51  ;;  %v1528_v15 = vpop.f32.mrf.mxu1  ;;  %v1374_v4 = vadd.f32 %v4092_v27, %v3719_v31  ;;  %v1080_v51 = vadd.f32 %v4093_v54, %v556_v1  ;;  %v1376_v0 = vadd.f32 %v4095_v7, %v3730_v38  ;;  %v4101_v27 = vld [vmem:[#allocation46_spill] sm:$0xff]  ;;  %v4102_v54 = vld [vmem:[#allocation47_spill] sm:$0xff] }
 0x158   :  { %2782 = vrcp.f32 %v1685_v34  ;;  %v1688_v8 = vadd.f32 1.0, %v2763_v44  ;;  %v2266_v57 = vmul.f32 -1.442695, %v1600_v11  ;;  %v1599_v62 = vadd.f32 %v1528_v15, %v1075_v22  ;;  %v3812_v34 = vpop.f32.mrf.mxu0  ;;  %v4098_v15 = vld [vmem:[#allocation51_spill] sm:$0xff] }
 0x159   :  { %v2765_v14 = vpop.eup %2764  ;;  %2784 = vpow2.f32 %v2263_v58  ;;  %v2694_v61 = vpop.f32.mrf.mxu1  ;;  %v1373_v22 = vadd.f32 %v4094_v5, %v3722_v33  ;;  %v4096_v58 = vld [vmem:[#allocation41_spill] sm:$0xff]  ;;  %v3819_v33 = vadd.f32 %v4098_v15, %v3736_v43 }
 0x15a   :  { %2786 = vrcp.f32 %v1688_v8  ;;  %v1687_v18 = vadd.f32 1.0, %v2765_v14  ;;  %v2265_v52 = vmul.f32 -1.442695, %v1599_v62  ;;  %v1602_v24 = vadd.f32 %v2694_v61, %v1078_v46  ;;  %v4099_v8 = vld [vmem:[#allocation43_spill] sm:$0xff] }
 0x15b   :  { %v2767_v3 = vpop.eup %2766  ;;  %2788 = vpow2.f32 %v2266_v57  ;;  %v1538_v26 = vpop.f32.mrf.mxu1  ;;  %v1079_v31 = vadd.f32 %v4096_v58, %v555_v42  ;;  %v1375_v46 = vadd.f32 %v4097_v39, %v3733_v41  ;;  %v1082_v38 = vadd.f32 %v4099_v8, %v558_v16  ;;  %v4100_v41 = vld [vmem:[#allocation44_spill] sm:$0xff] }
 0x15c   :  { %2790 = vrcp.f32 %v1687_v18  ;;  %v1690_v25 = vadd.f32 1.0, %v2767_v3  ;;  %v2268_v40 = vmul.f32 -1.442695, %v1602_v24  ;;  %v1601_v12 = vadd.f32 %v1538_v26, %v1077_v63  ;;  %v3824_v63 = vpop.f32.mrf.mxu0 }
 0x15d   :  { %v2769_v36 = vpop.eup %2768  ;;  %2792 = vpow2.f32 %v2265_v52  ;;  %v2697_v1 = vpop.f32.mrf.mxu1  ;;  %v1081_v61 = vadd.f32 %v4100_v41, %v557_v17 }
 0x15e   :  { %2794 = vrcp.f32 %v1690_v25  ;;  %v1689_v11 = vadd.f32 1.0, %v2769_v36  ;;  %v2267_v44 = vmul.f32 -1.442695, %v1601_v12  ;;  %v1604_v9 = vadd.f32 %v2697_v1, %v1080_v51  ;;  %v3830_v36 = vpop.f32.mrf.mxu0 }
 0x15f   :  { %v2771_v50 = vpop.eup %2770  ;;  %2796 = vpow2.f32 %v2268_v40  ;;  %v1548_v57 = vpop.f32.mrf.mxu1  ;;  %v1083_v51 = vadd.f32 %v4102_v54, %v559_v13 }
 0x160   :  { %v2773_v62 = vpop.eup %2772  ;;  %2798 = vrcp.f32 %v1689_v11  ;;  %v2270_v42 = vmul.f32 -1.442695, %v1604_v9  ;;  %v1603_v14 = vadd.f32 %v1548_v57, %v1079_v31  ;;  %v1756_v28 = vadd.f32 %v2771_v50, %v1374_v4  ;;  %v4104_v50 = vld [vmem:[#allocation50_spill] sm:$0xff] }
 0x161   :  { %v2775_v6 = vpop.eup %2774  ;;  %v1692_v18 = vadd.f32 1.0, %v2773_v62  ;;  %2800 = vpow2.f32 %v2267_v44  ;;  %v2700_v43 = vpop.f32.mrf.mxu1  ;;  %v1084_v4 = vadd.f32 %v4101_v27, %v3789_v60  ;;  %v4103_v44 = vld [vmem:[#allocation49_spill] sm:$0xff]  ;;  %v1085_v39 = vadd.f32 %v4104_v50, %v3803_v2 }
 0x162   :  { %v2777_v52 = vpop.eup %2776  ;;  %2802 = vpow2.f32 %v2270_v42  ;;  %v2269_v16 = vmul.f32 -1.442695, %v1603_v14  ;;  %v1606_v24 = vadd.f32 %v2700_v43, %v1082_v38  ;;  %v1755_v3 = vadd.f32 %v2775_v6, %v1373_v22  ;;  %v3838_v14 = vpop.f32.mrf.mxu0 }
 0x163   :  { %v2779_v10 = vpop.eup %2778  ;;  %2804 = vrcp.f32 %v1692_v18  ;;  %v1691_v20 = vadd.f32 1.0, %v2777_v52  ;;  %v1558_v49 = vpop.f32.mrf.mxu1  ;;  %v1780_v7 = vmax.f32 %v1756_v28, 0.0  ;;  %v1086_v9 = vadd.f32 %v4103_v44, %v3796_v19 }
 0x164   :  { %v2781_v26 = vpop.eup %2780  ;;  %2806 = vpow2.f32 %v2269_v16  ;;  %v2272_v17 = vmul.f32 -1.442695, %v1606_v24  ;;  %v1605_v25 = vadd.f32 %v1558_v49, %v1081_v61  ;;  %v1779_v40 = vmax.f32 %v1755_v3, 0.0 }
 0x165   :  { %v2783_v12 = vpop.eup %2782  ;;  %2808 = vrcp.f32 %v1691_v20  ;;  %v1694_v5 = vadd.f32 1.0, %v2781_v26  ;;  %v2703_v22 = vpop.f32.mrf.mxu1  ;;  %v1758_v58 = vadd.f32 %v2779_v10, %v1376_v0  ;;  %v1380_v52 = vadd.f32 %v3700_v48, %v3745_v45  ;;  %v4105_v26 = vld [vmem:[#allocation14_spill] sm:$0xff] }
 0x166   :  { %v2785_v31 = vpop.eup %2784  ;;  %2810 = vpow2.f32 %v2272_v17  ;;  %v2271_v60 = vmul.f32 -1.442695, %v1605_v25  ;;  %v1608_v13 = vadd.f32 %v2703_v22, %v1084_v4  ;;  %2715 = vmatprep.mubr.msk.f32.mxu0 %vm1807_vm2, %v1779_v40  ;;  %v1757_v1 = vadd.f32 %v2783_v12, %v1375_v46 }
 0x167   :  { %v2787_v11 = vpop.eup %2786  ;;  %2812 = vrcp.f32 %v1694_v5  ;;  %v1693_v15 = vadd.f32 1.0, %v2785_v31  ;;  %v1568_v8 = vpop.f32.mrf.mxu1  ;;  %2716 = vmatmul.mubr.msk.f32.vlgmr.msra.gmra.mxu0 %vm1807_vm2, %v1780_v7  ;;  %v1782_v19 = vmax.f32 %v1758_v58, 0.0  ;;  %v1379_v16 = vadd.f32 %v3726_v56, %v3748_v47  ;;  %v4106_v5 = vld [vmem:[#allocation15_spill] sm:$0xff] }
 0x168   :  { %v2789_v0 = vpop.eup %2788  ;;  %2814 = vpow2.f32 %v2271_v60  ;;  %v2274_v38 = vmul.f32 -1.442695, %v1608_v13  ;;  %v1607_v57 = vadd.f32 %v1568_v8, %v1083_v51  ;;  %v1781_v62 = vmax.f32 %v1757_v1, 0.0  ;;  %v3847_v51 = vpop.f32.mrf.mxu0 }
 0x169   :  { %v2791_v42 = vpop.eup %2790  ;;  %2816 = vrcp.f32 %v1693_v15  ;;  %v1696_v46 = vadd.f32 1.0, %v2789_v0  ;;  %v2706_v28 = vpop.f32.mrf.mxu1  ;;  %v1760_v6 = vadd.f32 %v2787_v11, %v3819_v33  ;;  %v860_v17 = vadd.f32 %v4105_v26, %v3709_v29  ;;  %v4109_v0 = vld [vmem:[#allocation16_spill] sm:$0xff]  ;;  %v4115_v26 = vld [vmem:[#allocation7_spill] sm:$0xff] }
 0x16a   :  { %v2793_v2 = vpop.eup %2792  ;;  %2818 = vpow2.f32 %v2274_v38  ;;  %v2273_v41 = vmul.f32 -1.442695, %v1607_v57  ;;  %v1610_v61 = vadd.f32 %v2706_v28, %v1086_v9  ;;  %2718 = vmatprep.mubr.msk.f32.mxu0 %vm1807_vm2, %v1781_v62  ;;  %v1759_v18 = vadd.f32 %v2791_v42, %v1377_v59  ;;  %v3859_v13 = vpop.f32.mrf.mxu0 }
 0x16b   :  { %v2795_v43 = vpop.eup %2794  ;;  %2820 = vrcp.f32 %v1696_v46  ;;  %v1695_v24 = vadd.f32 1.0, %v2793_v2  ;;  %v1578_v3 = vpop.f32.mrf.mxu1  ;;  %2719 = vmatmul.mubr.msk.f32.gmra.mxu0 %vm1807_vm2, %v1782_v19  ;;  %v1784_v20 = vmax.f32 %v1760_v6, 0.0  ;;  %v1382_v25 = vadd.f32 %v3752_v30, %v3756_v53  ;;  %v4110_v2 = vld [vmem:[#allocation4_spill] sm:$0xff] }
 0x16c   :  { %v2797_v33 = vpop.eup %2796  ;;  %2822 = vpow2.f32 %v2273_v41  ;;  %v2276_v10 = vmul.f32 -1.442695, %v1610_v61  ;;  %v1609_v27 = vadd.f32 %v1578_v3, %v1085_v39  ;;  %v1783_v4 = vmax.f32 %v1759_v18, 0.0  ;;  %v3870_v62 = vpop.f32.mrf.mxu0  ;;  %v4111_v61 = vld [vmem:[#allocation18_spill] sm:$0xff] }
 0x16d   :  { %v2799_v54 = vpop.eup %2798  ;;  %2824 = vrcp.f32 %v1695_v24  ;;  %v1698_v59 = vadd.f32 1.0, %v2797_v33  ;;  %v1762_v48 = vadd.f32 %v2795_v43, %v1380_v52  ;;  %v859_v22 = vadd.f32 %v4106_v5, %v3716_v37  ;;  %v4107_v37 = vld [vmem:[#allocation2_spill] sm:$0xff] }
 0x16e   :  { %v2801_v45 = vpop.eup %2800  ;;  %2826 = vpow2.f32 %v2276_v10  ;;  %v2275_v56 = vmul.f32 -1.442695, %v1609_v27  ;;  %2721 = vmatprep.mubr.msk.f32.mxu0 %vm1807_vm2, %v1783_v4  ;;  %v1761_v47 = vadd.f32 %v2799_v54, %v1379_v16  ;;  %v1381_v60 = vadd.f32 %v3770_v23, %v3759_v55  ;;  %v4108_v23 = vld [vmem:[#allocation3_spill] sm:$0xff]  ;;  %v4112_v16 = vld [vmem:[#allocation5_spill] sm:$0xff]  ;;  %v1344_v54 = vpop.f32.mrf.mxu0 }
 0x16f   :  { %v2803_v49 = vpop.eup %2802  ;;  %2828 = vrcp.f32 %v1698_v59  ;;  %v1697_v40 = vadd.f32 1.0, %v2801_v45  ;;  %2722 = vmatmul.mubr.msk.f32.gmra.mxu0 %vm1807_vm2, %v1784_v20  ;;  %v1786_v29 = vmax.f32 %v1762_v48, 0.0  ;;  %v339_v44 = vadd.f32 %v4107_v37, %v3672_v32  ;;  %v4113_v10 = vld [vmem:[#allocation21_spill] sm:$0xff]  ;;  %v4114_v48 = vld [vmem:[#allocation6_spill] sm:$0xff] }
 0x170   :  { %v2805_v12 = vpop.eup %2804  ;;  %v1700_v7 = vadd.f32 1.0, %v2803_v49  ;;  %2830 = vpow2.f32 %v2275_v56  ;;  %v1785_v58 = vmax.f32 %v1761_v47, 0.0  ;;  %v1384_v9 = vadd.f32 %v3782_v35, %v860_v17 }
 0x171   :  { %v2807_v31 = vpop.eup %2806  ;;  %2832 = vrcp.f32 %v1697_v40  ;;  %v1764_v30 = vadd.f32 %v2805_v12, %v1382_v25  ;;  %v338_v39 = vadd.f32 %v3672_v32, %v4108_v23  ;;  %v862_v38 = vadd.f32 %v4109_v0, %v339_v44  ;;  %v4116_v25 = vld [vmem:[#allocation24_spill] sm:$0xff]  ;;  %v4121_v0 = vld [vmem:[#allocation29_spill] sm:$0xff] }
 0x172   :  { %v2809_v53 = vpop.eup %2808  ;;  %2834 = vrcp.f32 %v1700_v7  ;;  %v1699_v1 = vadd.f32 1.0, %v2807_v31  ;;  %2724 = vmatprep.mubr.msk.f32.mxu0 %vm1807_vm2, %v1785_v58  ;;  %v1383_v57 = vadd.f32 %v3798_v21, %v859_v22  ;;  %v341_v41 = vadd.f32 %v4110_v2, %v3672_v32  ;;  %v4117_v22 = vld [vmem:[#allocation8_spill] sm:$0xff]  ;;  %v4118_v58 = vld [vmem:[#allocation27_spill] sm:$0xff] }
 0x173   :  { %v2811_v11 = vpop.eup %2810  ;;  %2725 = vmatmul.mubr.msk.f32.gmra.mxu0 %vm1807_vm2, %v1786_v29  ;;  %v1763_v50 = vadd.f32 %v2809_v53, %v1381_v60  ;;  %v1788_v19 = vmax.f32 %v1764_v30, 0.0  ;;  %v861_v18 = vadd.f32 %v4111_v61, %v338_v39  ;;  %v1386_v43 = vadd.f32 %v3812_v34, %v862_v38  ;;  %v4119_v30 = vld [vmem:[#allocation28_spill] sm:$0xff]  ;;  %v4120_v39 = vld [vmem:[#allocation9_spill] sm:$0xff] }
 0x174   :  { %v2813_v55 = vpop.eup %2812  ;;  %2836 = vrcp.f32 %v1699_v1  ;;  %v1702_v15 = vadd.f32 1.0, %v2811_v11  ;;  %v340_v24 = vadd.f32 %v3672_v32, %v4112_v16  ;;  %v864_v27 = vadd.f32 %v4113_v10, %v341_v41  ;;  %v2665_v11 = vpop.f32.mrf.mxu0  ;;  %v4126_v10 = vld [vmem:[#allocation12_spill] sm:$0xff] }
 0x175   :  { %v2815_v8 = vpop.eup %2814  ;;  %v1787_v42 = vmax.f32 %v1763_v50, 0.0  ;;  %v1766_v46 = vadd.f32 %v2813_v55, %v1384_v9  ;;  %v1385_v4 = vadd.f32 %v3824_v63, %v861_v18  ;;  %v343_v45 = vadd.f32 %v4114_v48, %v3672_v32 }
 0x176   :  { %v2817_v28 = vpop.eup %2816  ;;  %2838 = vrcp.f32 %v1702_v15  ;;  %v1701_v35 = vadd.f32 1.0, %v2815_v8  ;;  %v342_v17 = vadd.f32 %v3672_v32, %v4115_v26  ;;  %v863_v40 = vadd.f32 %v4116_v25, %v340_v24 }
 0x177   :  { %v2819_v6 = vpop.eup %2818  ;;  %2727 = vmatprep.mubr.msk.f32.mxu0 %vm1807_vm2, %v1787_v42  ;;  %v1765_v52 = vadd.f32 %v2817_v28, %v1383_v57  ;;  %v1790_v47 = vmax.f32 %v1766_v46, 0.0  ;;  %v1388_v12 = vadd.f32 %v3830_v36, %v864_v27  ;;  %v345_v7 = vadd.f32 %v4117_v22, %v3672_v32  ;;  %v1354_v28 = vpop.f32.mrf.mxu0 }
 0x178   :  { %v2821_v21 = vpop.eup %2820  ;;  %2840 = vrcp.f32 %v1701_v35  ;;  %v1704_v3 = vadd.f32 1.0, %v2819_v6  ;;  %2728 = vmatmul.mubr.msk.f32.gmra.mxu0 %vm1807_vm2, %v1788_v19  ;;  %v866_v31 = vadd.f32 %v4118_v58, %v343_v45  ;;  %v865_v53 = vadd.f32 %v4119_v30, %v342_v17  ;;  %v4123_v19 = vld [vmem:[#allocation30_spill] sm:$0xff] }
 0x179   :  { %v2823_v33 = vpop.eup %2822  ;;  %v1789_v59 = vmax.f32 %v1765_v52, 0.0  ;;  %v1768_v20 = vadd.f32 %v2821_v21, %v1386_v43  ;;  %v1387_v1 = vadd.f32 %v3838_v14, %v863_v40  ;;  %v344_v15 = vadd.f32 %v3672_v32, %v4120_v39  ;;  %v4124_v43 = vld [vmem:[#allocation11_spill] sm:$0xff] }
 0x17a   :  { %v2825_v34 = vpop.eup %2824  ;;  %2842 = vrcp.f32 %v1704_v3  ;;  %v1703_v56 = vadd.f32 1.0, %v2823_v33  ;;  %v1390_v9 = vadd.f32 %v3847_v51, %v866_v31  ;;  %v868_v38 = vadd.f32 %v4121_v0, %v345_v7  ;;  %v4122_v51 = vld [vmem:[#allocation10_spill] sm:$0xff]  ;;  %v4125_v52 = vld [vmem:[#allocation31_spill] sm:$0xff] }
 0x17b   :  { %v2827_v49 = vpop.eup %2826  ;;  %2730 = vmatprep.mubr.msk.f32.mxu0 %vm1807_vm2, %v1789_v59  ;;  %v1767_v63 = vadd.f32 %v2825_v34, %v1385_v4  ;;  %v1792_v55 = vmax.f32 %v1768_v20, 0.0  ;;  %v1389_v14 = vadd.f32 %v3859_v13, %v865_v53  ;;  %v347_v46 = vadd.f32 %v4122_v51, %v3672_v32  ;;  %v4127_v4 = vld [vmem:[#allocation32_spill] sm:$0xff] }
 0x17c   :  { %v2829_v5 = vpop.eup %2828  ;;  %2844 = vrcp.f32 %v1703_v56  ;;  %v1706_v60 = vadd.f32 1.0, %v2827_v49  ;;  %2731 = vmatmul.mubr.msk.f32.gmra.mxu0 %vm1807_vm2, %v1790_v47  ;;  %v867_v6 = vadd.f32 %v4123_v19, %v344_v15  ;;  %v1392_v2 = vadd.f32 %v3870_v62, %v868_v38  ;;  %v2668_v62 = vpop.f32.mrf.mxu0  ;;  %v4128_v56 = vld [vmem:[#allocation13_spill] sm:$0xff] }
 0x17d   :  { %v2831_v29 = vpop.eup %2830  ;;  %v1791_v36 = vmax.f32 %v1767_v63, 0.0  ;;  %v1770_v37 = vadd.f32 %v2829_v5, %v1388_v12  ;;  %v346_v13 = vadd.f32 %v3672_v32, %v4124_v43  ;;  %v870_v21 = vadd.f32 %v4125_v52, %v347_v46  ;;  %v4129_v47 = vld [vmem:[#allocation33_spill] sm:$0xff]  ;;  %v4130_v63 = vld [vmem:[#allocation36_spill] sm:$0xff] }
 0x17e   :  { %v2833_v44 = vpop.eup %2832  ;;  %2846 = vrcp.f32 %v1706_v60  ;;  %v1705_v50 = vadd.f32 1.0, %v2831_v29  ;;  %v1391_v16 = vadd.f32 %v1344_v54, %v867_v6  ;;  %v349_v27 = vadd.f32 %v4126_v10, %v3672_v32  ;;  %v1364_v12 = vpop.f32.mrf.mxu0 }
 0x17f   :  { %v2835_v23 = vpop.eup %2834  ;;  %2733 = vmatprep.mubr.msk.f32.mxu0 %vm1807_vm2, %v1791_v36  ;;  %v1769_v8 = vadd.f32 %v2833_v44, %v1387_v1  ;;  %v1794_v41 = vmax.f32 %v1770_v37, 0.0  ;;  %v869_v59 = vadd.f32 %v4127_v4, %v346_v13  ;;  %v1394_v20 = vadd.f32 %v2665_v11, %v870_v21 }
 0x180   :  { %2848 = vrcp.f32 %v1705_v50  ;;  %2734 = vmatmul.mubr.msk.f32.gmra.mxu0 %vm1807_vm2, %v1792_v55  ;;  %v1772_v57 = vadd.f32 %v2835_v23, %v1390_v9  ;;  %v348_v54 = vadd.f32 %v3672_v32, %v4128_v56  ;;  %v872_v49 = vadd.f32 %v4129_v47, %v349_v27 }
 0x181   :  { %v2837_v42 = vpop.eup %2836  ;;  %v1793_v35 = vmax.f32 %v1769_v8, 0.0  ;;  %v1393_v26 = vadd.f32 %v1354_v28, %v869_v59  ;;  %v2850_v37 = vmov 0.0  }
 0x182   :  { %v1771_v61 = vadd.f32 %v2837_v42, %v1389_v14  ;;  %v1796_v34 = vmax.f32 %v1772_v57, 0.0  ;;  %v871_v5 = vadd.f32 %v4130_v63, %v348_v54  ;;  %v1396_v22 = vadd.f32 %v2668_v62, %v872_v49  ;;  %2092 = vst.msk [vmem:[%s4030_s6 + $0xbe] sm:$0x3] %vm2091_vm3, %v2850_v37 }
 0x183   :  { %v2839_v18 = vpop.eup %2838  ;;  %2736 = vmatprep.mubr.msk.f32.mxu0 %vm1807_vm2, %v1793_v35 }
 0x184   :  { %2737 = vmatmul.mubr.msk.f32.gmra.mxu0 %vm1807_vm2, %v1794_v41  ;;  %v1795_v24 = vmax.f32 %v1771_v61, 0.0  ;;  %v1774_v3 = vadd.f32 %v2839_v18, %v1392_v2  ;;  %v1395_v60 = vadd.f32 %v1364_v12, %v871_v5 }
 0x185   :  { %v2841_v33 = vpop.eup %2840 }
 0x186   :  { %2739 = vmatprep.mubr.msk.f32.mxu0 %vm1807_vm2, %v1795_v24  ;;  %v1773_v48 = vadd.f32 %v2841_v33, %v1391_v16  ;;  %v1798_v7 = vmax.f32 %v1774_v3, 0.0 }
 0x187   :  { %v2843_v45 = vpop.eup %2842 }
 0x188   :  { %2740 = vmatmul.mubr.msk.f32.gmra.mxu0 %vm1807_vm2, %v1796_v34  ;;  %v1797_v17 = vmax.f32 %v1773_v48, 0.0  ;;  %v1776_v25 = vadd.f32 %v2843_v45, %v1394_v20 }
 0x189   :  { %v2845_v40 = vpop.eup %2844 }
 0x18a   :  { %2742 = vmatprep.mubr.msk.f32.mxu0 %vm1807_vm2, %v1797_v17  ;;  %v1775_v58 = vadd.f32 %v2845_v40, %v1393_v26  ;;  %v1800_v53 = vmax.f32 %v1776_v25, 0.0 }
 0x18b   :  { %v2847_v31 = vpop.eup %2846 }
 0x18c   :  { %2743 = vmatmul.mubr.msk.f32.gmra.mxu0 %vm1807_vm2, %v1798_v7  ;;  %v1799_v32 = vmax.f32 %v1775_v58, 0.0  ;;  %v1778_v29 = vadd.f32 %v2847_v31, %v1396_v22 }
 0x18d   :  { %v2849_v30 = vpop.eup %2848 }
 0x18e   :  { %2745 = vmatprep.mubr.msk.f32.mxu0 %vm1807_vm2, %v1799_v32  ;;  %v1777_v1 = vadd.f32 %v2849_v30, %v1395_v60  ;;  %v1802_v36 = vmax.f32 %v1778_v29, 0.0 }
 0x190   :  { %2746 = vmatmul.mubr.msk.f32.gmra.mxu0 %vm1807_vm2, %v1800_v53  ;;  %v1801_v11 = vmax.f32 %v1777_v1, 0.0 }
 0x192   :  { %2748 = vmatprep.mubr.msk.f32.mxu0 %vm1807_vm2, %v1801_v11 }
 0x194   :  { %2749 = vmatmul.mubr.msk.f32.gmra.mxu0 %vm1807_vm2, %v1802_v36 }
 0x227   :  { %v2717_v44 = vpop.f32.mrf.mxu0 }
 0x228   :  { %2067 = vst.msk [vmem:[%s4030_s6 + $0x8] sm:$0xff] %vm2065_vm4, %v2717_v44 }
 0x229   :  { %v1946_v9 = vpop.f32.mrf.mxu0 }
 0x22a   :  { %2066 = vst.msk [vmem:[%s4030_s6] sm:$0xff] %vm2065_vm4, %v1946_v9 }
 0x22b   :  { %v2720_v50 = vpop.f32.mrf.mxu0 }
 0x22c   :  { %2069 = vst.msk [vmem:[%s4030_s6 + $0x18] sm:$0xff] %vm2065_vm4, %v2720_v50 }
 0x22d   :  { %v1956_v55 = vpop.f32.mrf.mxu0 }
 0x22e   :  { %2068 = vst.msk [vmem:[%s4030_s6 + $0x10] sm:$0xff] %vm2065_vm4, %v1956_v55 }
 0x22f   :  { %v2723_v23 = vpop.f32.mrf.mxu0 }
 0x230   :  { %2071 = vst.msk [vmem:[%s4030_s6 + $0x28] sm:$0xff] %vm2065_vm4, %v2723_v23 }
 0x231   :  { %v1966_v39 = vpop.f32.mrf.mxu0 }
 0x232   :  { %2070 = vst.msk [vmem:[%s4030_s6 + $0x20] sm:$0xff] %vm2065_vm4, %v1966_v39 }
 0x233   :  { %v2726_v15 = vpop.f32.mrf.mxu0 }
 0x234   :  { %2073 = vst.msk [vmem:[%s4030_s6 + $0x38] sm:$0xff] %vm2065_vm4, %v2726_v15 }
 0x235   :  { %v1976_v8 = vpop.f32.mrf.mxu0 }
 0x236   :  { %2072 = vst.msk [vmem:[%s4030_s6 + $0x30] sm:$0xff] %vm2065_vm4, %v1976_v8 }
 0x238   :  { %v2729_v0 = vpop.f32.mrf.mxu0 }
 0x239   :  { %2075 = vst.msk [vmem:[%s4030_s6 + $0x48] sm:$0xff] %vm2065_vm4, %v2729_v0 }
 0x23a   :  { %v1986_v38 = vpop.f32.mrf.mxu0 }
 0x23b   :  { %2074 = vst.msk [vmem:[%s4030_s6 + $0x40] sm:$0xff] %vm2065_vm4, %v1986_v38 }
 0x23c   :  { %v2732_v14 = vpop.f32.mrf.mxu0 }
 0x23d   :  { %2077 = vst.msk [vmem:[%s4030_s6 + $0x58] sm:$0xff] %vm2065_vm4, %v2732_v14 }
 0x23e   :  { %v1996_v57 = vpop.f32.mrf.mxu0 }
 0x23f   :  { %2076 = vst.msk [vmem:[%s4030_s6 + $0x50] sm:$0xff] %vm2065_vm4, %v1996_v57 }
 0x240   :  { %v2735_v42 = vpop.f32.mrf.mxu0 }
 0x241   :  { %2079 = vst.msk [vmem:[%s4030_s6 + $0x68] sm:$0xff] %vm2065_vm4, %v2735_v42 }
 0x242   :  { %v2006_v51 = vpop.f32.mrf.mxu0 }
 0x243   :  { %2078 = vst.msk [vmem:[%s4030_s6 + $0x60] sm:$0xff] %vm2065_vm4, %v2006_v51 }
 0x244   :  { %v2738_v46 = vpop.f32.mrf.mxu0 }
 0x245   :  { %2081 = vst.msk [vmem:[%s4030_s6 + $0x78] sm:$0xff] %vm2065_vm4, %v2738_v46 }
 0x246   :  { %v2016_v28 = vpop.f32.mrf.mxu0 }
 0x247   :  { %2080 = vst.msk [vmem:[%s4030_s6 + $0x70] sm:$0xff] %vm2065_vm4, %v2016_v28 }
 0x248   :  { %v2741_v35 = vpop.f32.mrf.mxu0 }
 0x249   :  { %2083 = vst.msk [vmem:[%s4030_s6 + $0x88] sm:$0xff] %vm2065_vm4, %v2741_v35 }
 0x24a   :  { %v2026_v19 = vpop.f32.mrf.mxu0 }
 0x24b   :  { %2082 = vst.msk [vmem:[%s4030_s6 + $0x80] sm:$0xff] %vm2065_vm4, %v2026_v19 }
 0x24c   :  { %v2744_v6 = vpop.f32.mrf.mxu0 }
 0x24d   :  { %2085 = vst.msk [vmem:[%s4030_s6 + $0x98] sm:$0xff] %vm2065_vm4, %v2744_v6 }
 0x24e   :  { %v2036_v2 = vpop.f32.mrf.mxu0 }
 0x24f   :  { %2084 = vst.msk [vmem:[%s4030_s6 + $0x90] sm:$0xff] %vm2065_vm4, %v2036_v2 }
 0x250   :  { %v2747_v41 = vpop.f32.mrf.mxu0 }
 0x251   :  { %2087 = vst.msk [vmem:[%s4030_s6 + $0xa8] sm:$0xff] %vm2065_vm4, %v2747_v41 }
 0x252   :  { %v2046_v61 = vpop.f32.mrf.mxu0 }
 0x253   :  { %2086 = vst.msk [vmem:[%s4030_s6 + $0xa0] sm:$0xff] %vm2065_vm4, %v2046_v61 }
 0x254   :  { %v2750_v18 = vpop.f32.mrf.mxu0 }
 0x255   :  { %2090 = vst.msk [vmem:[%s4030_s6 + $0xb8] sm:$0x3f] %vm2089_vm5, %v2750_v18 }
 0x256   :  { %v2056_v43 = vpop.f32.mrf.mxu0 }
 0x257   :  { %2088 = vst.msk [vmem:[%s4030_s6 + $0xb0] sm:$0xff] %vm2065_vm4, %v2056_v43 }

</bundles_post_ra>
